<compile_context>
chip_gen: v7x
topology: tpu7x:2x2x1
jax: 0.10.0
libtpu: 0.0.40
codegen_flags: <defaults>
</compile_context>

<pallas_src>
import functools

import jax
import jax.numpy as jnp
from jax import lax
from jax.experimental import pallas as pl
from jax.experimental.pallas import tpu as pltpu


# ----------------------------------------------------------------------------
# hardware-aware helpers
# ----------------------------------------------------------------------------

_VMEM_CAP = None


def _vmem_capacity_bytes():
    global _VMEM_CAP
    if _VMEM_CAP is None:
        try:
            _VMEM_CAP = int(pltpu.get_tpu_info().vmem_capacity_bytes)
        except Exception:
            _VMEM_CAP = 64 << 20          # conservative (v7x-sized) fallback
    return _VMEM_CAP


def _multi_tensorcore_chip():
    """True only for chips with >1 TensorCore (v7x); gates the megacore N-split."""
    try:
        kind = jax.devices()[0].device_kind.lower()
    except Exception:
        return False
    return "v7" in kind


def _clamp_vmem(need_bytes):
    cap = _vmem_capacity_bytes()
    return int(min(cap * 3 // 4, max(need_bytes * 3 // 2, 32 << 20)))


def _round_up(x, m):
    return (x + m - 1) // m * m


def _largest_divisor(n, ok):
    best = 1
    for d in range(1, n + 1):
        if n % d == 0 and ok(d):
            best = d
    return best


def _plan_tiles(K, N, weight_budget, split_n=False):
    """Lane-aligned (tk, tn) that exactly divide the 128-padded dims and keep a
    single bf16 weight tile within `weight_budget` bytes."""
    K_pad = _round_up(K, 128)
    N_pad = _round_up(N, 128)
    tk, tn = K_pad, N_pad

    def fits(a, b):
        return a * b * 2 <= weight_budget      # bf16 weight tile

    if not fits(tk, tn):
        if K_pad >= N_pad:
            tk = 128 * _largest_divisor(K_pad // 128, lambda d: fits(d * 128, tn))
            if not fits(tk, tn):
                tn = 128 * _largest_divisor(N_pad // 128, lambda d: fits(tk, d * 128))
        else:
            tn = 128 * _largest_divisor(N_pad // 128, lambda d: fits(tk, d * 128))
            if not fits(tk, tn):
                tk = 128 * _largest_divisor(K_pad // 128, lambda d: fits(d * 128, tn))

    # Feed both v7x TensorCores along the "parallel" N axis when there would
    # otherwise be a single N block.  Single-TC chips (v5e/v6e) keep full N.
    if split_n and N_pad // tn == 1 and N_pad >= 256 and (N_pad // 128) % 2 == 0:
        tn = N_pad // 2
    return tk, K_pad, tn, N_pad


def _fit(a, shape):
    """Zero-pad / slice a 2-D array to `shape` (padding stays exactly zero)."""
    R, C = shape
    a = a[:R, :C]
    pr, pc = R - a.shape[0], C - a.shape[1]
    if pr or pc:
        a = jnp.pad(a, ((0, pr), (0, pc)))
    return a


def _pad_to(a, shape, dtype):
    out = jnp.zeros(shape, dtype)
    return out.at[: a.shape[0], : a.shape[1]].set(a.astype(dtype))


# ----------------------------------------------------------------------------
# Pallas kernel: tiled matmul, f32 accumulation directly into the output block
# ----------------------------------------------------------------------------

def _linear_kernel(x_ref, w_ref, b_ref, o_ref, *, activation):
    k = pl.program_id(1)

    @pl.when(k == 0)
    def _():
        o_ref[...] = jnp.zeros_like(o_ref)

    # bf16 x bf16 MXU matmul with f32 accumulation into the resident out block.
    o_ref[...] += jnp.dot(x_ref[...], w_ref[...],
                          preferred_element_type=jnp.float32)

    @pl.when(k == pl.num_programs(1) - 1)
    def _():
        y = o_ref[...] + b_ref[...]
        if activation == "relu":
            y = jnp.maximum(y, 0.0)
        elif activation == "tanh":
            y = jnp.tanh(y)
        o_ref[...] = y


def linear(x, lp, activation="none"):
    """y = act(x @ W + b) with padded, divisor-aligned tiles (f32 output)."""
    w, b = lp["w"], lp["b"]
    K_pad, N_pad = w.shape
    tk, tn = lp["tk"], lp["tn"]

    M = x.shape[0]
    M_pad = _round_up(max(M, 8), 8)          # fill sublanes
    tm = M_pad

    x = _fit(x, (M_pad, K_pad)).astype(jnp.bfloat16)

    grid = (N_pad // tn, K_pad // tk)        # reduction axis last

    need = 2 * (tm * tk * 2 + tk * tn * 2 + tn * 4 + tm * tn * 4)
    vmem_limit = _clamp_vmem(need)

    cost = pl.CostEstimate(
        flops=int(2 * M_pad * K_pad * N_pad),
        transcendentals=int(M_pad * N_pad) if activation == "tanh" else 0,
        bytes_accessed=int(M_pad * K_pad * 2 + K_pad * N_pad * 2
                           + N_pad * 4 + M_pad * N_pad * 4))

    kernel = functools.partial(_linear_kernel, activation=activation)

    return pl.pallas_call(
        kernel,
        out_shape=jax.ShapeDtypeStruct((M_pad, N_pad), jnp.float32),
        grid_spec=pltpu.PrefetchScalarGridSpec(
            num_scalar_prefetch=0,
            grid=grid,
            in_specs=[pl.BlockSpec((tm, tk), lambda j, k: (0, k)),
                      pl.BlockSpec((tk, tn), lambda j, k: (k, j)),
                      pl.BlockSpec((1, tn), lambda j, k: (0, j))],
            out_specs=pl.BlockSpec((tm, tn), lambda j, k: (0, j)),
        ),
        compiler_params=pltpu.CompilerParams(
            dimension_semantics=("parallel", "arbitrary"),
            vmem_limit_bytes=vmem_limit),
        cost_estimate=cost,
    )(x, w, b)


# ----------------------------------------------------------------------------
# Pallas kernel: the whole transformer stack in one call (grid over layers)
# ----------------------------------------------------------------------------

def _masked_layer_norm(z, g, b, n_valid, eps):
    # padded lanes of z/g/b are exactly zero -> they stay zero in the output.
    mask = lax.broadcasted_iota(jnp.int32, z.shape, 1) < n_valid
    mean = jnp.sum(jnp.where(mask, z, 0.0), axis=-1, keepdims=True) * (1.0 / n_valid)
    c = jnp.where(mask, z - mean, 0.0)
    var = jnp.sum(c * c, axis=-1, keepdims=True) * (1.0 / n_valid)
    return c * lax.rsqrt(var + eps) * g + b


def _stack_kernel(h_ref, wa_ref, ba_ref, g1_ref, be1_ref,
                  w1_ref, b1_ref, w2_ref, b2_ref, g2_ref, be2_ref,
                  o_ref, *, n_valid, eps):
    l = pl.program_id(0)

    @pl.when(l == 0)
    def _():
        o_ref[...] = h_ref[...]

    h = o_ref[...]

    # Self-attention over a length-1 sequence == folded affine out_proj(v_proj).
    a = jnp.dot(h.astype(jnp.bfloat16), wa_ref[0],
                preferred_element_type=jnp.float32) + ba_ref[0]
    z = _masked_layer_norm(h + a, g1_ref[0], be1_ref[0], n_valid, eps)

    # Feed-forward (relu) block + post-norm.
    f = jnp.dot(z.astype(jnp.bfloat16), w1_ref[0],
                preferred_element_type=jnp.float32) + b1_ref[0]
    f = jnp.maximum(f, 0.0)
    y = jnp.dot(f.astype(jnp.bfloat16), w2_ref[0],
                preferred_element_type=jnp.float32) + b2_ref[0]
    o_ref[...] = _masked_layer_norm(z + y, g2_ref[0], be2_ref[0], n_valid, eps)


def transformer_stack(h, sp):
    L = sp["L"]
    if L == 0:
        return h
    M_pad, H_pad = h.shape
    F_pad = sp["F_pad"]

    def wspec(d1, d2):
        return pl.BlockSpec((1, d1, d2), lambda l: (l, 0, 0))

    in_specs = [
        pl.BlockSpec((M_pad, H_pad), lambda l: (0, 0)),   # h_in (resident)
        wspec(H_pad, H_pad),  # W_attn
        wspec(1, H_pad),      # b_attn
        wspec(1, H_pad),      # ln1 gamma
        wspec(1, H_pad),      # ln1 beta
        wspec(H_pad, F_pad),  # W1
        wspec(1, F_pad),      # b1
        wspec(F_pad, H_pad),  # W2
        wspec(1, H_pad),      # b2
        wspec(1, H_pad),      # ln2 gamma
        wspec(1, H_pad),      # ln2 beta
    ]
    args = (h.astype(jnp.float32), sp["wa"], sp["ba"], sp["ln1_g"], sp["ln1_b"],
            sp["w1"], sp["b1"], sp["w2"], sp["b2"], sp["ln2_g"], sp["ln2_b"])

    layer_w_bytes = 2 * (H_pad * H_pad + 2 * H_pad * F_pad)
    need = 2 * layer_w_bytes + 16 * 4 * (H_pad + F_pad) + 4 * M_pad * H_pad * 4
    vmem_limit = _clamp_vmem(need)

    cost = pl.CostEstimate(
        flops=int(2 * L * M_pad * (H_pad * H_pad + 2 * H_pad * F_pad)),
        transcendentals=0,
        bytes_accessed=int(L * layer_w_bytes + 2 * M_pad * H_pad * 4))

    kernel = functools.partial(_stack_kernel, n_valid=sp["H"], eps=sp["eps"])

    return pl.pallas_call(
        kernel,
        out_shape=jax.ShapeDtypeStruct((M_pad, H_pad), jnp.float32),
        grid_spec=pltpu.PrefetchScalarGridSpec(
            num_scalar_prefetch=0,
            grid=(L,),
            in_specs=in_specs,
            out_specs=pl.BlockSpec((M_pad, H_pad), lambda l: (0, 0)),
        ),
        compiler_params=pltpu.CompilerParams(
            dimension_semantics=("arbitrary",),
            vmem_limit_bytes=vmem_limit),
        cost_estimate=cost,
    )(*args)


# ----------------------------------------------------------------------------
# Parameter prep (padded bf16 weights, folded attention, stacked layers)
# ----------------------------------------------------------------------------

def make_linear_params(w, b):
    K, N = w.shape
    budget = max(_vmem_capacity_bytes() // 5, 4 << 20)
    tk, K_pad, tn, N_pad = _plan_tiles(K, N, budget,
                                       split_n=_multi_tensorcore_chip())
    w_pad = jnp.zeros((K_pad, N_pad), jnp.bfloat16).at[:K, :N].set(
        w.astype(jnp.bfloat16))
    b_pad = jnp.zeros((1, N_pad), jnp.float32).at[:, :N].set(
        b.reshape(1, N).astype(jnp.float32))
    return dict(w=w_pad, b=b_pad, tk=tk, tn=tn, K=K, N=N)


def init_params(key, input_size, hidden, num_layers):
    def dense(k, fan_in, fan_out):
        kw, kb = jax.random.split(k)
        w = jax.random.normal(kw, (fan_in, fan_out), jnp.float32) * 0.02
        b = jax.random.normal(kb, (fan_out,), jnp.float32) * 0.02
        return w, b

    keys = jax.random.split(key, 3 + num_layers)
    params = {"input_size": input_size}

    ew, eb = dense(keys[0], input_size, hidden)
    params["enc"] = make_linear_params(ew, eb)

    H, F = hidden, 4 * hidden
    H_pad, F_pad = _round_up(H, 128), _round_up(F, 128)
    ones = jnp.ones((1, H), jnp.float32)
    zeros = jnp.zeros((1, H), jnp.float32)

    wa_l, ba_l, g1_l, be1_l = [], [], [], []
    w1_l, b1_l, w2_l, b2_l, g2_l, be2_l = [], [], [], [], [], []
    for l in range(num_layers):
        lk = jax.random.split(keys[3 + l], 4)
        # Q/K projections & softmax are inert for a length-1 sequence:
        # attention == out_proj(v_proj(h)), folded into one affine map.
        wv, bv = dense(lk[0], H, H)
        wo, bo = dense(lk[1], H, H)
        w1, b1 = dense(lk[2], H, F)
        w2, b2 = dense(lk[3], F, H)
        wa_l.append(_pad_to(wv @ wo, (H_pad, H_pad), jnp.bfloat16))
        ba_l.append(_pad_to((bv @ wo + bo).reshape(1, H), (1, H_pad), jnp.float32))
        g1_l.append(_pad_to(ones, (1, H_pad), jnp.float32))
        be1_l.append(_pad_to(zeros, (1, H_pad), jnp.float32))
        w1_l.append(_pad_to(w1, (H_pad, F_pad), jnp.bfloat16))
        b1_l.append(_pad_to(b1.reshape(1, F), (1, F_pad), jnp.float32))
        w2_l.append(_pad_to(w2, (F_pad, H_pad), jnp.bfloat16))
        b2_l.append(_pad_to(b2.reshape(1, H), (1, H_pad), jnp.float32))
        g2_l.append(_pad_to(ones, (1, H_pad), jnp.float32))
        be2_l.append(_pad_to(zeros, (1, H_pad), jnp.float32))

    params["stack"] = dict(
        L=num_layers, H=H, H_pad=H_pad, F_pad=F_pad, eps=1e-5,
        wa=jnp.stack(wa_l), ba=jnp.stack(ba_l),
        ln1_g=jnp.stack(g1_l), ln1_b=jnp.stack(be1_l),
        w1=jnp.stack(w1_l), b1=jnp.stack(b1_l),
        w2=jnp.stack(w2_l), b2=jnp.stack(b2_l),
        ln2_g=jnp.stack(g2_l), ln2_b=jnp.stack(be2_l))

    d1w, d1b = dense(keys[1], H, H // 2)
    d2w, d2b = dense(keys[2], H // 2, input_size)
    params["dec1"] = make_linear_params(d1w, d1b)
    params["dec2"] = make_linear_params(d2w, d2b)
    return params


# ----------------------------------------------------------------------------
# Forward pass (matches SimpleApolloModel.forward in eval mode)
# ----------------------------------------------------------------------------

def apollo_forward(params, x):
    B = x.shape[0]
    # x.view(B, -1, hidden//8) followed by x.view(B, -1) is just a flatten.
    x_flat = x.reshape(B, -1)

    # Encoder: Linear + ReLU (+ Dropout = identity at inference).
    h = linear(x_flat, params["enc"], activation="relu")

    # TransformerEncoder over a length-1 sequence: one fused pallas_call.
    h = transformer_stack(h, params["stack"])

    # Decoder: Linear -> ReLU -> (Dropout=id) -> Linear -> Tanh.
    d = linear(h, params["dec1"], activation="relu")
    out = linear(d, params["dec2"], activation="tanh")
    return out[:B, :params["input_size"]]


# ----------------------------------------------------------------------------
# Pure-jnp reference (same bf16 weights / folded attention) for validation
# ----------------------------------------------------------------------------

def _ref_linear(h, lp, activation="none"):
    K, N = lp["K"], lp["N"]
    w = lp["w"][:K, :N].astype(jnp.float32)
    b = lp["b"][0, :N]
    y = h.astype(jnp.bfloat16).astype(jnp.float32) @ w + b
    if activation == "relu":
        y = jnp.maximum(y, 0.0)
    elif activation == "tanh":
        y = jnp.tanh(y)
    return y


def _ref_ln(z, g, b, eps):
    m = jnp.mean(z, axis=-1, keepdims=True)
    v = jnp.mean((z - m) ** 2, axis=-1, keepdims=True)
    return (z - m) * lax.rsqrt(v + eps) * g + b


def reference_forward(params, x):
    B = x.shape[0]
    h = _ref_linear(x.reshape(B, -1), params["enc"], "relu")
    sp = params["stack"]
    H, F, eps = sp["H"], 4 * sp["H"], sp["eps"]
    for l in range(sp["L"]):
        hb = h.astype(jnp.bfloat16).astype(jnp.float32)
        a = hb @ sp["wa"][l, :H, :H].astype(jnp.float32) + sp["ba"][l, 0, :H]
        z = _ref_ln(h + a, sp["ln1_g"][l, 0, :H], sp["ln1_b"][l, 0, :H], eps)
        zb = z.astype(jnp.bfloat16).astype(jnp.float32)
        f = jnp.maximum(zb @ sp["w1"][l, :H, :F].astype(jnp.float32)
                        + sp["b1"][l, 0, :F], 0.0)
        fb = f.astype(jnp.bfloat16).astype(jnp.float32)
        y = fb @ sp["w2"][l, :F, :H].astype(jnp.float32) + sp["b2"][l, 0, :H]
        h = _ref_ln(z + y, sp["ln2_g"][l, 0, :H], sp["ln2_b"][l, 0, :H], eps)
    d = _ref_linear(h, params["dec1"], "relu")
    return _ref_linear(d, params["dec2"], "tanh")


# ----------------------------------------------------------------------------
# Main
# ----------------------------------------------------------------------------

if __name__ == "__main__":
    # Small stand-ins for the module defaults (input_size=132300, hidden=512,
    # num_layers=6); hidden kept divisible by nhead=8 and by 8 for the view.
    INPUT_SIZE = 1024
    HIDDEN = 64
    NUM_LAYERS = 2
    BATCH = 2

    key = jax.random.PRNGKey(0)
    kp, kx = jax.random.split(key)
    params = init_params(kp, INPUT_SIZE, HIDDEN, NUM_LAYERS)
    x = jax.random.normal(kx, (BATCH, INPUT_SIZE), dtype=jnp.float32)

    forward = jax.jit(functools.partial(apollo_forward, params))
    out = jax.block_until_ready(forward(x))

    assert out.shape == (BATCH, INPUT_SIZE), out.shape
    assert bool(jnp.all(jnp.isfinite(out)))

    ref = reference_forward(params, x)
    max_err = float(jnp.max(jnp.abs(out - ref)))
    assert max_err < 5e-2, f"mismatch vs reference: {max_err}"

    print("KERNEL_OK")
</pallas_src>

<mosaic_0001>
module attributes {stable_mosaic.version = 11 : i64} {
  func.func @_linear_kernel(%arg0: i32, %arg1: i32, %arg2: memref<8x1024xbf16, #tpu.memory_space<vmem>>, %arg3: memref<1024x128xbf16, #tpu.memory_space<vmem>>, %arg4: memref<1x128xf32, #tpu.memory_space<vmem>>, %arg5: memref<8x128xf32, #tpu.memory_space<vmem>>) attributes {dimension_semantics = [#tpu.dimension_semantics<parallel>, #tpu.dimension_semantics<arbitrary>], iteration_bounds = array<i64: 1, 1>, scalar_prefetch = 0 : i64, scratch_operands = 0 : i64, tpu.core_type = #tpu.core_type<tc>, window_params = [{transform_indices = @transform_0, window_bounds = array<i64: 8, 1024>}, {transform_indices = @transform_1, window_bounds = array<i64: 1024, 128>}, {transform_indices = @transform_2, window_bounds = array<i64: 1, 128>}, {transform_indices = @transform_3, window_bounds = array<i64: 8, 128>}]} {
    %c0_i32 = arith.constant 0 : i32
    %0 = arith.cmpi eq, %arg1, %c0_i32 : i32
    %1 = arith.extui %0 : i1 to i32
    %c0_i32_0 = arith.constant 0 : i32
    %2 = arith.cmpi ne, %1, %c0_i32_0 : i32
    scf.if %2 {
      %cst_10 = arith.constant 0.000000e+00 : f32
      %12 = vector.broadcast %cst_10 : f32 to vector<8x128xf32>
      %c0_11 = arith.constant 0 : index
      %c0_12 = arith.constant 0 : index
      %13 = vector.load %arg5[%c0_11, %c0_12] : memref<8x128xf32, #tpu.memory_space<vmem>>, vector<8x128xf32>
      tpu.vector_store %arg5[%c0_11, %c0_12], %12 {strides = array<i32>} : memref<8x128xf32, #tpu.memory_space<vmem>>, vector<8x128xf32>,
    } else {
    }
    %c0 = arith.constant 0 : index
    %c0_1 = arith.constant 0 : index
    %3 = vector.load %arg5[%c0, %c0_1] : memref<8x128xf32, #tpu.memory_space<vmem>>, vector<8x128xf32>
    %c0_2 = arith.constant 0 : index
    %c0_3 = arith.constant 0 : index
    %4 = vector.load %arg2[%c0_2, %c0_3] : memref<8x1024xbf16, #tpu.memory_space<vmem>>, vector<8x1024xbf16>
    %c0_4 = arith.constant 0 : index
    %c0_5 = arith.constant 0 : index
    %5 = vector.load %arg3[%c0_4, %c0_5] : memref<1024x128xbf16, #tpu.memory_space<vmem>>, vector<1024x128xbf16>
    %cst = arith.constant dense<0.000000e+00> : vector<8x128xf32>
    %6 = tpu.matmul %4, %5, %cst {dimension_numbers = #tpu.dot_dimension_numbers<[1], [0], [0], [1], [0, 0, 1, 1], [], []>} : vector<8x1024xbf16>, vector<1024x128xbf16>, vector<8x128xf32> -> vector<8x128xf32>
    %7 = arith.addf %3, %6 : vector<8x128xf32>
    %c0_6 = arith.constant 0 : index
    %c0_7 = arith.constant 0 : index
    %8 = vector.load %arg5[%c0_6, %c0_7] : memref<8x128xf32, #tpu.memory_space<vmem>>, vector<8x128xf32>
    tpu.vector_store %arg5[%c0_6, %c0_7], %7 {strides = array<i32>} : memref<8x128xf32, #tpu.memory_space<vmem>>, vector<8x128xf32>,
    %c0_i32_8 = arith.constant 0 : i32
    %9 = arith.cmpi eq, %arg1, %c0_i32_8 : i32
    %10 = arith.extui %9 : i1 to i32
    %c0_i32_9 = arith.constant 0 : i32
    %11 = arith.cmpi ne, %10, %c0_i32_9 : i32
    scf.if %11 {
      %c0_10 = arith.constant 0 : index
      %c0_11 = arith.constant 0 : index
      %12 = vector.load %arg5[%c0_10, %c0_11] : memref<8x128xf32, #tpu.memory_space<vmem>>, vector<8x128xf32>
      %c0_12 = arith.constant 0 : index
      %c0_13 = arith.constant 0 : index
      %13 = vector.load %arg4[%c0_12, %c0_13] : memref<1x128xf32, #tpu.memory_space<vmem>>, vector<1x128xf32>
      %14 = vector.broadcast %13 : vector<1x128xf32> to vector<8x128xf32>
      %15 = arith.addf %12, %14 : vector<8x128xf32>
      %cst_14 = arith.constant 0.000000e+00 : f32
      %16 = vector.broadcast %cst_14 : f32 to vector<8x128xf32>
      %17 = arith.maximumf %15, %16 : vector<8x128xf32>
      %c0_15 = arith.constant 0 : index
      %c0_16 = arith.constant 0 : index
      %18 = vector.load %arg5[%c0_15, %c0_16] : memref<8x128xf32, #tpu.memory_space<vmem>>, vector<8x128xf32>
      tpu.vector_store %arg5[%c0_15, %c0_16], %17 {strides = array<i32>} : memref<8x128xf32, #tpu.memory_space<vmem>>, vector<8x128xf32>,
    } else {
    }
    return
  }
  func.func @transform_0(%arg0: i32, %arg1: i32) -> (i32, i32) {
    %c0_i32 = arith.constant 0 : i32
    %c0_i32_0 = arith.constant 0 : i32
    return %c0_i32, %arg1 : i32, i32
  }
  func.func @transform_1(%arg0: i32, %arg1: i32) -> (i32, i32) {
    %c0_i32 = arith.constant 0 : i32
    return %arg1, %arg0 : i32, i32
  }
  func.func @transform_2(%arg0: i32, %arg1: i32) -> (i32, i32) {
    %c0_i32 = arith.constant 0 : i32
    %c0_i32_0 = arith.constant 0 : i32
    return %c0_i32, %arg0 : i32, i32
  }
  func.func @transform_3(%arg0: i32, %arg1: i32) -> (i32, i32) {
    %c0_i32 = arith.constant 0 : i32
    %c0_i32_0 = arith.constant 0 : i32
    return %c0_i32, %arg0 : i32, i32
  }
}

module attributes {stable_mosaic.version = 11 : i64} {
  func.func @_stack_kernel(%arg0: i32, %arg1: memref<8x128xf32, #tpu.memory_space<vmem>>, %arg2: memref<1x128x128xbf16, #tpu.memory_space<vmem>>, %arg3: memref<1x1x128xf32, #tpu.memory_space<vmem>>, %arg4: memref<1x1x128xf32, #tpu.memory_space<vmem>>, %arg5: memref<1x1x128xf32, #tpu.memory_space<vmem>>, %arg6: memref<1x128x256xbf16, #tpu.memory_space<vmem>>, %arg7: memref<1x1x256xf32, #tpu.memory_space<vmem>>, %arg8: memref<1x256x128xbf16, #tpu.memory_space<vmem>>, %arg9: memref<1x1x128xf32, #tpu.memory_space<vmem>>, %arg10: memref<1x1x128xf32, #tpu.memory_space<vmem>>, %arg11: memref<1x1x128xf32, #tpu.memory_space<vmem>>, %arg12: memref<8x128xf32, #tpu.memory_space<vmem>>) attributes {dimension_semantics = [#tpu.dimension_semantics<arbitrary>], iteration_bounds = array<i64: 2>, scalar_prefetch = 0 : i64, scratch_operands = 0 : i64, tpu.core_type = #tpu.core_type<tc>, window_params = [{pipeline_mode = #tpu.pipeline_mode<synchronous>, transform_indices = @transform_0, window_bounds = array<i64: 8, 128>}, {transform_indices = @transform_1, window_bounds = array<i64: 1, 128, 128>}, {transform_indices = @transform_2, window_bounds = array<i64: 1, 1, 128>}, {transform_indices = @transform_3, window_bounds = array<i64: 1, 1, 128>}, {transform_indices = @transform_4, window_bounds = array<i64: 1, 1, 128>}, {transform_indices = @transform_5, window_bounds = array<i64: 1, 128, 256>}, {transform_indices = @transform_6, window_bounds = array<i64: 1, 1, 256>}, {transform_indices = @transform_7, window_bounds = array<i64: 1, 256, 128>}, {transform_indices = @transform_8, window_bounds = array<i64: 1, 1, 128>}, {transform_indices = @transform_9, window_bounds = array<i64: 1, 1, 128>}, {transform_indices = @transform_10, window_bounds = array<i64: 1, 1, 128>}, {pipeline_mode = #tpu.pipeline_mode<synchronous>, transform_indices = @transform_11, window_bounds = array<i64: 8, 128>}]} {
    %c0_i32 = arith.constant 0 : i32
    %0 = arith.cmpi eq, %arg0, %c0_i32 : i32
    %1 = arith.extui %0 : i1 to i32
    %c0_i32_0 = arith.constant 0 : i32
    %2 = arith.cmpi ne, %1, %c0_i32_0 : i32
    scf.if %2 {
      %c0_52 = arith.constant 0 : index
      %c0_53 = arith.constant 0 : index
      %95 = vector.load %arg1[%c0_52, %c0_53] : memref<8x128xf32, #tpu.memory_space<vmem>>, vector<8x128xf32>
      %c0_54 = arith.constant 0 : index
      %c0_55 = arith.constant 0 : index
      %96 = vector.load %arg12[%c0_54, %c0_55] : memref<8x128xf32, #tpu.memory_space<vmem>>, vector<8x128xf32>
      tpu.vector_store %arg12[%c0_54, %c0_55], %95 {strides = array<i32>} : memref<8x128xf32, #tpu.memory_space<vmem>>, vector<8x128xf32>,
    } else {
    }
    %c0 = arith.constant 0 : index
    %c0_1 = arith.constant 0 : index
    %3 = vector.load %arg12[%c0, %c0_1] : memref<8x128xf32, #tpu.memory_space<vmem>>, vector<8x128xf32>
    %4 = arith.truncf %3 : vector<8x128xf32> to vector<8x128xbf16>
    %c0_2 = arith.constant 0 : index
    %c0_3 = arith.constant 0 : index
    %c0_4 = arith.constant 0 : index
    %5 = vector.load %arg2[%c0_2, %c0_3, %c0_4] : memref<1x128x128xbf16, #tpu.memory_space<vmem>>, vector<1x128x128xbf16>
    %6 = vector.shape_cast %5 : vector<1x128x128xbf16> to vector<128x128xbf16>
    %cst = arith.constant dense<0.000000e+00> : vector<8x128xf32>
    %7 = tpu.matmul %4, %6, %cst {dimension_numbers = #tpu.dot_dimension_numbers<[1], [0], [0], [1], [0, 0, 1, 1], [], []>} : vector<8x128xbf16>, vector<128x128xbf16>, vector<8x128xf32> -> vector<8x128xf32>
    %c0_5 = arith.constant 0 : index
    %c0_6 = arith.constant 0 : index
    %c0_7 = arith.constant 0 : index
    %8 = vector.load %arg3[%c0_5, %c0_6, %c0_7] : memref<1x1x128xf32, #tpu.memory_space<vmem>>, vector<1x1x128xf32>
    %9 = vector.shape_cast %8 : vector<1x1x128xf32> to vector<1x128xf32>
    %10 = vector.broadcast %9 : vector<1x128xf32> to vector<8x128xf32>
    %11 = arith.addf %7, %10 : vector<8x128xf32>
    %12 = arith.addf %3, %11 : vector<8x128xf32>
    %c0_8 = arith.constant 0 : index
    %c0_9 = arith.constant 0 : index
    %c0_10 = arith.constant 0 : index
    %13 = vector.load %arg4[%c0_8, %c0_9, %c0_10] : memref<1x1x128xf32, #tpu.memory_space<vmem>>, vector<1x1x128xf32>
    %14 = vector.shape_cast %13 : vector<1x1x128xf32> to vector<1x128xf32>
    %c0_11 = arith.constant 0 : index
    %c0_12 = arith.constant 0 : index
    %c0_13 = arith.constant 0 : index
    %15 = vector.load %arg5[%c0_11, %c0_12, %c0_13] : memref<1x1x128xf32, #tpu.memory_space<vmem>>, vector<1x1x128xf32>
    %16 = vector.shape_cast %15 : vector<1x1x128xf32> to vector<1x128xf32>
    %17 = tpu.iota {dimensions = array<i32: 1>} : vector<8x128xi32>
    %c64_i32 = arith.constant 64 : i32
    %18 = vector.broadcast %c64_i32 : i32 to vector<8x128xi32>
    %19 = arith.cmpi slt, %17, %18 : vector<8x128xi32>
    %cst_14 = arith.constant 0.000000e+00 : f32
    %20 = vector.broadcast %cst_14 : f32 to vector<8x128xf32>
    %21 = arith.select %19, %12, %20 : vector<8x128xi1>, vector<8x128xf32>
    %cst_15 = arith.constant dense<0.000000e+00> : vector<8xf32>
    %22 = vector.multi_reduction <add>, %21, %cst_15 [1] : vector<8x128xf32> to vector<8xf32>
    %23 = vector.shape_cast %22 : vector<8xf32> to vector<8x1xf32>
    %cst_16 = arith.constant 1.562500e-02 : f32
    %24 = vector.broadcast %cst_16 : f32 to vector<8x1xf32>
    %25 = arith.mulf %23, %24 : vector<8x1xf32>
    %26 = vector.broadcast %25 : vector<8x1xf32> to vector<8x128xf32>
    %27 = arith.subf %12, %26 : vector<8x128xf32>
    %cst_17 = arith.constant 0.000000e+00 : f32
    %28 = vector.broadcast %cst_17 : f32 to vector<8x128xf32>
    %29 = arith.select %19, %27, %28 : vector<8x128xi1>, vector<8x128xf32>
    %30 = arith.mulf %29, %29 : vector<8x128xf32>
    %cst_18 = arith.constant dense<0.000000e+00> : vector<8xf32>
    %31 = vector.multi_reduction <add>, %30, %cst_18 [1] : vector<8x128xf32> to vector<8xf32>
    %32 = vector.shape_cast %31 : vector<8xf32> to vector<8x1xf32>
    %cst_19 = arith.constant 1.562500e-02 : f32
    %33 = vector.broadcast %cst_19 : f32 to vector<8x1xf32>
    %34 = arith.mulf %32, %33 : vector<8x1xf32>
    %cst_20 = arith.constant 9.99999974E-6 : f32
    %35 = vector.broadcast %cst_20 : f32 to vector<8x1xf32>
    %36 = arith.addf %34, %35 : vector<8x1xf32>
    %37 = math.rsqrt %36 : vector<8x1xf32>
    %38 = vector.broadcast %37 : vector<8x1xf32> to vector<8x128xf32>
    %39 = arith.mulf %29, %38 : vector<8x128xf32>
    %40 = vector.broadcast %14 : vector<1x128xf32> to vector<8x128xf32>
    %41 = arith.mulf %39, %40 : vector<8x128xf32>
    %42 = vector.broadcast %16 : vector<1x128xf32> to vector<8x128xf32>
    %43 = arith.addf %41, %42 : vector<8x128xf32>
    %44 = arith.truncf %43 : vector<8x128xf32> to vector<8x128xbf16>
    %c0_21 = arith.constant 0 : index
    %c0_22 = arith.constant 0 : index
    %c0_23 = arith.constant 0 : index
    %45 = vector.load %arg6[%c0_21, %c0_22, %c0_23] : memref<1x128x256xbf16, #tpu.memory_space<vmem>>, vector<1x128x256xbf16>
    %46 = vector.shape_cast %45 : vector<1x128x256xbf16> to vector<128x256xbf16>
    %cst_24 = arith.constant dense<0.000000e+00> : vector<8x256xf32>
    %47 = tpu.matmul %44, %46, %cst_24 {dimension_numbers = #tpu.dot_dimension_numbers<[1], [0], [0], [1], [0, 0, 1, 1], [], []>} : vector<8x128xbf16>, vector<128x256xbf16>, vector<8x256xf32> -> vector<8x256xf32>
    %c0_25 = arith.constant 0 : index
    %c0_26 = arith.constant 0 : index
    %c0_27 = arith.constant 0 : index
    %48 = vector.load %arg7[%c0_25, %c0_26, %c0_27] : memref<1x1x256xf32, #tpu.memory_space<vmem>>, vector<1x1x256xf32>
    %49 = vector.shape_cast %48 : vector<1x1x256xf32> to vector<1x256xf32>
    %50 = vector.broadcast %49 : vector<1x256xf32> to vector<8x256xf32>
    %51 = arith.addf %47, %50 : vector<8x256xf32>
    %cst_28 = arith.constant 0.000000e+00 : f32
    %52 = vector.broadcast %cst_28 : f32 to vector<8x256xf32>
    %53 = arith.maximumf %51, %52 : vector<8x256xf32>
    %54 = arith.truncf %53 : vector<8x256xf32> to vector<8x256xbf16>
    %c0_29 = arith.constant 0 : index
    %c0_30 = arith.constant 0 : index
    %c0_31 = arith.constant 0 : index
    %55 = vector.load %arg8[%c0_29, %c0_30, %c0_31] : memref<1x256x128xbf16, #tpu.memory_space<vmem>>, vector<1x256x128xbf16>
    %56 = vector.shape_cast %55 : vector<1x256x128xbf16> to vector<256x128xbf16>
    %cst_32 = arith.constant dense<0.000000e+00> : vector<8x128xf32>
    %57 = tpu.matmul %54, %56, %cst_32 {dimension_numbers = #tpu.dot_dimension_numbers<[1], [0], [0], [1], [0, 0, 1, 1], [], []>} : vector<8x256xbf16>, vector<256x128xbf16>, vector<8x128xf32> -> vector<8x128xf32>
    %c0_33 = arith.constant 0 : index
    %c0_34 = arith.constant 0 : index
    %c0_35 = arith.constant 0 : index
    %58 = vector.load %arg9[%c0_33, %c0_34, %c0_35] : memref<1x1x128xf32, #tpu.memory_space<vmem>>, vector<1x1x128xf32>
    %59 = vector.shape_cast %58 : vector<1x1x128xf32> to vector<1x128xf32>
    %60 = vector.broadcast %59 : vector<1x128xf32> to vector<8x128xf32>
    %61 = arith.addf %57, %60 : vector<8x128xf32>
    %62 = arith.addf %43, %61 : vector<8x128xf32>
    %c0_36 = arith.constant 0 : index
    %c0_37 = arith.constant 0 : index
    %c0_38 = arith.constant 0 : index
    %63 = vector.load %arg10[%c0_36, %c0_37, %c0_38] : memref<1x1x128xf32, #tpu.memory_space<vmem>>, vector<1x1x128xf32>
    %64 = vector.shape_cast %63 : vector<1x1x128xf32> to vector<1x128xf32>
    %c0_39 = arith.constant 0 : index
    %c0_40 = arith.constant 0 : index
    %c0_41 = arith.constant 0 : index
    %65 = vector.load %arg11[%c0_39, %c0_40, %c0_41] : memref<1x1x128xf32, #tpu.memory_space<vmem>>, vector<1x1x128xf32>
    %66 = vector.shape_cast %65 : vector<1x1x128xf32> to vector<1x128xf32>
    %67 = tpu.iota {dimensions = array<i32: 1>} : vector<8x128xi32>
    %c64_i32_42 = arith.constant 64 : i32
    %68 = vector.broadcast %c64_i32_42 : i32 to vector<8x128xi32>
    %69 = arith.cmpi slt, %67, %68 : vector<8x128xi32>
    %cst_43 = arith.constant 0.000000e+00 : f32
    %70 = vector.broadcast %cst_43 : f32 to vector<8x128xf32>
    %71 = arith.select %69, %62, %70 : vector<8x128xi1>, vector<8x128xf32>
    %cst_44 = arith.constant dense<0.000000e+00> : vector<8xf32>
    %72 = vector.multi_reduction <add>, %71, %cst_44 [1] : vector<8x128xf32> to vector<8xf32>
    %73 = vector.shape_cast %72 : vector<8xf32> to vector<8x1xf32>
    %cst_45 = arith.constant 1.562500e-02 : f32
    %74 = vector.broadcast %cst_45 : f32 to vector<8x1xf32>
    %75 = arith.mulf %73, %74 : vector<8x1xf32>
    %76 = vector.broadcast %75 : vector<8x1xf32> to vector<8x128xf32>
    %77 = arith.subf %62, %76 : vector<8x128xf32>
    %cst_46 = arith.constant 0.000000e+00 : f32
    %78 = vector.broadcast %cst_46 : f32 to vector<8x128xf32>
    %79 = arith.select %69, %77, %78 : vector<8x128xi1>, vector<8x128xf32>
    %80 = arith.mulf %79, %79 : vector<8x128xf32>
    %cst_47 = arith.constant dense<0.000000e+00> : vector<8xf32>
    %81 = vector.multi_reduction <add>, %80, %cst_47 [1] : vector<8x128xf32> to vector<8xf32>
    %82 = vector.shape_cast %81 : vector<8xf32> to vector<8x1xf32>
    %cst_48 = arith.constant 1.562500e-02 : f32
    %83 = vector.broadcast %cst_48 : f32 to vector<8x1xf32>
    %84 = arith.mulf %82, %83 : vector<8x1xf32>
    %cst_49 = arith.constant 9.99999974E-6 : f32
    %85 = vector.broadcast %cst_49 : f32 to vector<8x1xf32>
    %86 = arith.addf %84, %85 : vector<8x1xf32>
    %87 = math.rsqrt %86 : vector<8x1xf32>
    %88 = vector.broadcast %87 : vector<8x1xf32> to vector<8x128xf32>
    %89 = arith.mulf %79, %88 : vector<8x128xf32>
    %90 = vector.broadcast %64 : vector<1x128xf32> to vector<8x128xf32>
    %91 = arith.mulf %89, %90 : vector<8x128xf32>
    %92 = vector.broadcast %66 : vector<1x128xf32> to vector<8x128xf32>
    %93 = arith.addf %91, %92 : vector<8x128xf32>
    %c0_50 = arith.constant 0 : index
    %c0_51 = arith.constant 0 : index
    %94 = vector.load %arg12[%c0_50, %c0_51] : memref<8x128xf32, #tpu.memory_space<vmem>>, vector<8x128xf32>
    tpu.vector_store %arg12[%c0_50, %c0_51], %93 {strides = array<i32>} : memref<8x128xf32, #tpu.memory_space<vmem>>, vector<8x128xf32>,
    return
  }
  func.func @transform_0(%arg0: i32) -> (i32, i32) {
    %c0_i32 = arith.constant 0 : i32
    %c0_i32_0 = arith.constant 0 : i32
    %c0_i32_1 = arith.constant 0 : i32
    return %c0_i32, %c0_i32_0 : i32, i32
  }
  func.func @transform_1(%arg0: i32) -> (i32, i32, i32) {
    %c0_i32 = arith.constant 0 : i32
    %c0_i32_0 = arith.constant 0 : i32
    %c0_i32_1 = arith.constant 0 : i32
    return %arg0, %c0_i32, %c0_i32_0 : i32, i32, i32
  }
  func.func @transform_2(%arg0: i32) -> (i32, i32, i32) {
    %c0_i32 = arith.constant 0 : i32
    %c0_i32_0 = arith.constant 0 : i32
    %c0_i32_1 = arith.constant 0 : i32
    return %arg0, %c0_i32, %c0_i32_0 : i32, i32, i32
  }
  func.func @transform_3(%arg0: i32) -> (i32, i32, i32) {
    %c0_i32 = arith.constant 0 : i32
    %c0_i32_0 = arith.constant 0 : i32
    %c0_i32_1 = arith.constant 0 : i32
    return %arg0, %c0_i32, %c0_i32_0 : i32, i32, i32
  }
  func.func @transform_4(%arg0: i32) -> (i32, i32, i32) {
    %c0_i32 = arith.constant 0 : i32
    %c0_i32_0 = arith.constant 0 : i32
    %c0_i32_1 = arith.constant 0 : i32
    return %arg0, %c0_i32, %c0_i32_0 : i32, i32, i32
  }
  func.func @transform_5(%arg0: i32) -> (i32, i32, i32) {
    %c0_i32 = arith.constant 0 : i32
    %c0_i32_0 = arith.constant 0 : i32
    %c0_i32_1 = arith.constant 0 : i32
    return %arg0, %c0_i32, %c0_i32_0 : i32, i32, i32
  }
  func.func @transform_6(%arg0: i32) -> (i32, i32, i32) {
    %c0_i32 = arith.constant 0 : i32
    %c0_i32_0 = arith.constant 0 : i32
    %c0_i32_1 = arith.constant 0 : i32
    return %arg0, %c0_i32, %c0_i32_0 : i32, i32, i32
  }
  func.func @transform_7(%arg0: i32) -> (i32, i32, i32) {
    %c0_i32 = arith.constant 0 : i32
    %c0_i32_0 = arith.constant 0 : i32
    %c0_i32_1 = arith.constant 0 : i32
    return %arg0, %c0_i32, %c0_i32_0 : i32, i32, i32
  }
  func.func @transform_8(%arg0: i32) -> (i32, i32, i32) {
    %c0_i32 = arith.constant 0 : i32
    %c0_i32_0 = arith.constant 0 : i32
    %c0_i32_1 = arith.constant 0 : i32
    return %arg0, %c0_i32, %c0_i32_0 : i32, i32, i32
  }
  func.func @transform_9(%arg0: i32) -> (i32, i32, i32) {
    %c0_i32 = arith.constant 0 : i32
    %c0_i32_0 = arith.constant 0 : i32
    %c0_i32_1 = arith.constant 0 : i32
    return %arg0, %c0_i32, %c0_i32_0 : i32, i32, i32
  }
  func.func @transform_10(%arg0: i32) -> (i32, i32, i32) {
    %c0_i32 = arith.constant 0 : i32
    %c0_i32_0 = arith.constant 0 : i32
    %c0_i32_1 = arith.constant 0 : i32
    return %arg0, %c0_i32, %c0_i32_0 : i32, i32, i32
  }
  func.func @transform_11(%arg0: i32) -> (i32, i32) {
    %c0_i32 = arith.constant 0 : i32
    %c0_i32_0 = arith.constant 0 : i32
    %c0_i32_1 = arith.constant 0 : i32
    return %c0_i32, %c0_i32_0 : i32, i32
  }
}

module attributes {stable_mosaic.version = 11 : i64} {
  func.func @_linear_kernel(%arg0: i32, %arg1: i32, %arg2: memref<8x128xbf16, #tpu.memory_space<vmem>>, %arg3: memref<128x128xbf16, #tpu.memory_space<vmem>>, %arg4: memref<1x128xf32, #tpu.memory_space<vmem>>, %arg5: memref<8x128xf32, #tpu.memory_space<vmem>>) attributes {dimension_semantics = [#tpu.dimension_semantics<parallel>, #tpu.dimension_semantics<arbitrary>], iteration_bounds = array<i64: 1, 1>, scalar_prefetch = 0 : i64, scratch_operands = 0 : i64, tpu.core_type = #tpu.core_type<tc>, window_params = [{transform_indices = @transform_0, window_bounds = array<i64: 8, 128>}, {transform_indices = @transform_1, window_bounds = array<i64: 128, 128>}, {transform_indices = @transform_2, window_bounds = array<i64: 1, 128>}, {transform_indices = @transform_3, window_bounds = array<i64: 8, 128>}]} {
    %c0_i32 = arith.constant 0 : i32
    %0 = arith.cmpi eq, %arg1, %c0_i32 : i32
    %1 = arith.extui %0 : i1 to i32
    %c0_i32_0 = arith.constant 0 : i32
    %2 = arith.cmpi ne, %1, %c0_i32_0 : i32
    scf.if %2 {
      %cst_10 = arith.constant 0.000000e+00 : f32
      %12 = vector.broadcast %cst_10 : f32 to vector<8x128xf32>
      %c0_11 = arith.constant 0 : index
      %c0_12 = arith.constant 0 : index
      %13 = vector.load %arg5[%c0_11, %c0_12] : memref<8x128xf32, #tpu.memory_space<vmem>>, vector<8x128xf32>
      tpu.vector_store %arg5[%c0_11, %c0_12], %12 {strides = array<i32>} : memref<8x128xf32, #tpu.memory_space<vmem>>, vector<8x128xf32>,
    } else {
    }
    %c0 = arith.constant 0 : index
    %c0_1 = arith.constant 0 : index
    %3 = vector.load %arg5[%c0, %c0_1] : memref<8x128xf32, #tpu.memory_space<vmem>>, vector<8x128xf32>
    %c0_2 = arith.constant 0 : index
    %c0_3 = arith.constant 0 : index
    %4 = vector.load %arg2[%c0_2, %c0_3] : memref<8x128xbf16, #tpu.memory_space<vmem>>, vector<8x128xbf16>
    %c0_4 = arith.constant 0 : index
    %c0_5 = arith.constant 0 : index
    %5 = vector.load %arg3[%c0_4, %c0_5] : memref<128x128xbf16, #tpu.memory_space<vmem>>, vector<128x128xbf16>
    %cst = arith.constant dense<0.000000e+00> : vector<8x128xf32>
    %6 = tpu.matmul %4, %5, %cst {dimension_numbers = #tpu.dot_dimension_numbers<[1], [0], [0], [1], [0, 0, 1, 1], [], []>} : vector<8x128xbf16>, vector<128x128xbf16>, vector<8x128xf32> -> vector<8x128xf32>
    %7 = arith.addf %3, %6 : vector<8x128xf32>
    %c0_6 = arith.constant 0 : index
    %c0_7 = arith.constant 0 : index
    %8 = vector.load %arg5[%c0_6, %c0_7] : memref<8x128xf32, #tpu.memory_space<vmem>>, vector<8x128xf32>
    tpu.vector_store %arg5[%c0_6, %c0_7], %7 {strides = array<i32>} : memref<8x128xf32, #tpu.memory_space<vmem>>, vector<8x128xf32>,
    %c0_i32_8 = arith.constant 0 : i32
    %9 = arith.cmpi eq, %arg1, %c0_i32_8 : i32
    %10 = arith.extui %9 : i1 to i32
    %c0_i32_9 = arith.constant 0 : i32
    %11 = arith.cmpi ne, %10, %c0_i32_9 : i32
    scf.if %11 {
      %c0_10 = arith.constant 0 : index
      %c0_11 = arith.constant 0 : index
      %12 = vector.load %arg5[%c0_10, %c0_11] : memref<8x128xf32, #tpu.memory_space<vmem>>, vector<8x128xf32>
      %c0_12 = arith.constant 0 : index
      %c0_13 = arith.constant 0 : index
      %13 = vector.load %arg4[%c0_12, %c0_13] : memref<1x128xf32, #tpu.memory_space<vmem>>, vector<1x128xf32>
      %14 = vector.broadcast %13 : vector<1x128xf32> to vector<8x128xf32>
      %15 = arith.addf %12, %14 : vector<8x128xf32>
      %cst_14 = arith.constant 0.000000e+00 : f32
      %16 = vector.broadcast %cst_14 : f32 to vector<8x128xf32>
      %17 = arith.maximumf %15, %16 : vector<8x128xf32>
      %c0_15 = arith.constant 0 : index
      %c0_16 = arith.constant 0 : index
      %18 = vector.load %arg5[%c0_15, %c0_16] : memref<8x128xf32, #tpu.memory_space<vmem>>, vector<8x128xf32>
      tpu.vector_store %arg5[%c0_15, %c0_16], %17 {strides = array<i32>} : memref<8x128xf32, #tpu.memory_space<vmem>>, vector<8x128xf32>,
    } else {
    }
    return
  }
  func.func @transform_0(%arg0: i32, %arg1: i32) -> (i32, i32) {
    %c0_i32 = arith.constant 0 : i32
    %c0_i32_0 = arith.constant 0 : i32
    return %c0_i32, %arg1 : i32, i32
  }
  func.func @transform_1(%arg0: i32, %arg1: i32) -> (i32, i32) {
    %c0_i32 = arith.constant 0 : i32
    return %arg1, %arg0 : i32, i32
  }
  func.func @transform_2(%arg0: i32, %arg1: i32) -> (i32, i32) {
    %c0_i32 = arith.constant 0 : i32
    %c0_i32_0 = arith.constant 0 : i32
    return %c0_i32, %arg0 : i32, i32
  }
  func.func @transform_3(%arg0: i32, %arg1: i32) -> (i32, i32) {
    %c0_i32 = arith.constant 0 : i32
    %c0_i32_0 = arith.constant 0 : i32
    return %c0_i32, %arg0 : i32, i32
  }
}

module attributes {stable_mosaic.version = 11 : i64} {
  func.func @_linear_kernel(%arg0: i32, %arg1: i32, %arg2: memref<8x128xbf16, #tpu.memory_space<vmem>>, %arg3: memref<128x1024xbf16, #tpu.memory_space<vmem>>, %arg4: memref<1x1024xf32, #tpu.memory_space<vmem>>, %arg5: memref<8x1024xf32, #tpu.memory_space<vmem>>) attributes {dimension_semantics = [#tpu.dimension_semantics<parallel>, #tpu.dimension_semantics<arbitrary>], iteration_bounds = array<i64: 1, 1>, scalar_prefetch = 0 : i64, scratch_operands = 0 : i64, tpu.core_type = #tpu.core_type<tc>, window_params = [{transform_indices = @transform_0, window_bounds = array<i64: 8, 128>}, {transform_indices = @transform_1, window_bounds = array<i64: 128, 1024>}, {transform_indices = @transform_2, window_bounds = array<i64: 1, 1024>}, {transform_indices = @transform_3, window_bounds = array<i64: 8, 1024>}]} {
    %c0_i32 = arith.constant 0 : i32
    %0 = arith.cmpi eq, %arg1, %c0_i32 : i32
    %1 = arith.extui %0 : i1 to i32
    %c0_i32_0 = arith.constant 0 : i32
    %2 = arith.cmpi ne, %1, %c0_i32_0 : i32
    scf.if %2 {
      %cst_10 = arith.constant 0.000000e+00 : f32
      %12 = vector.broadcast %cst_10 : f32 to vector<8x1024xf32>
      %c0_11 = arith.constant 0 : index
      %c0_12 = arith.constant 0 : index
      %13 = vector.load %arg5[%c0_11, %c0_12] : memref<8x1024xf32, #tpu.memory_space<vmem>>, vector<8x1024xf32>
      tpu.vector_store %arg5[%c0_11, %c0_12], %12 {strides = array<i32>} : memref<8x1024xf32, #tpu.memory_space<vmem>>, vector<8x1024xf32>,
    } else {
    }
    %c0 = arith.constant 0 : index
    %c0_1 = arith.constant 0 : index
    %3 = vector.load %arg5[%c0, %c0_1] : memref<8x1024xf32, #tpu.memory_space<vmem>>, vector<8x1024xf32>
    %c0_2 = arith.constant 0 : index
    %c0_3 = arith.constant 0 : index
    %4 = vector.load %arg2[%c0_2, %c0_3] : memref<8x128xbf16, #tpu.memory_space<vmem>>, vector<8x128xbf16>
    %c0_4 = arith.constant 0 : index
    %c0_5 = arith.constant 0 : index
    %5 = vector.load %arg3[%c0_4, %c0_5] : memref<128x1024xbf16, #tpu.memory_space<vmem>>, vector<128x1024xbf16>
    %cst = arith.constant dense<0.000000e+00> : vector<8x1024xf32>
    %6 = tpu.matmul %4, %5, %cst {dimension_numbers = #tpu.dot_dimension_numbers<[1], [0], [0], [1], [0, 0, 1, 1], [], []>} : vector<8x128xbf16>, vector<128x1024xbf16>, vector<8x1024xf32> -> vector<8x1024xf32>
    %7 = arith.addf %3, %6 : vector<8x1024xf32>
    %c0_6 = arith.constant 0 : index
    %c0_7 = arith.constant 0 : index
    %8 = vector.load %arg5[%c0_6, %c0_7] : memref<8x1024xf32, #tpu.memory_space<vmem>>, vector<8x1024xf32>
    tpu.vector_store %arg5[%c0_6, %c0_7], %7 {strides = array<i32>} : memref<8x1024xf32, #tpu.memory_space<vmem>>, vector<8x1024xf32>,
    %c0_i32_8 = arith.constant 0 : i32
    %9 = arith.cmpi eq, %arg1, %c0_i32_8 : i32
    %10 = arith.extui %9 : i1 to i32
    %c0_i32_9 = arith.constant 0 : i32
    %11 = arith.cmpi ne, %10, %c0_i32_9 : i32
    scf.if %11 {
      %c0_10 = arith.constant 0 : index
      %c0_11 = arith.constant 0 : index
      %12 = vector.load %arg5[%c0_10, %c0_11] : memref<8x1024xf32, #tpu.memory_space<vmem>>, vector<8x1024xf32>
      %c0_12 = arith.constant 0 : index
      %c0_13 = arith.constant 0 : index
      %13 = vector.load %arg4[%c0_12, %c0_13] : memref<1x1024xf32, #tpu.memory_space<vmem>>, vector<1x1024xf32>
      %14 = vector.broadcast %13 : vector<1x1024xf32> to vector<8x1024xf32>
      %15 = arith.addf %12, %14 : vector<8x1024xf32>
      %16 = math.tanh %15 : vector<8x1024xf32>
      %c0_14 = arith.constant 0 : index
      %c0_15 = arith.constant 0 : index
      %17 = vector.load %arg5[%c0_14, %c0_15] : memref<8x1024xf32, #tpu.memory_space<vmem>>, vector<8x1024xf32>
      tpu.vector_store %arg5[%c0_14, %c0_15], %16 {strides = array<i32>} : memref<8x1024xf32, #tpu.memory_space<vmem>>, vector<8x1024xf32>,
    } else {
    }
    return
  }
  func.func @transform_0(%arg0: i32, %arg1: i32) -> (i32, i32) {
    %c0_i32 = arith.constant 0 : i32
    %c0_i32_0 = arith.constant 0 : i32
    return %c0_i32, %arg1 : i32, i32
  }
  func.func @transform_1(%arg0: i32, %arg1: i32) -> (i32, i32) {
    %c0_i32 = arith.constant 0 : i32
    return %arg1, %arg0 : i32, i32
  }
  func.func @transform_2(%arg0: i32, %arg1: i32) -> (i32, i32) {
    %c0_i32 = arith.constant 0 : i32
    %c0_i32_0 = arith.constant 0 : i32
    return %c0_i32, %arg0 : i32, i32
  }
  func.func @transform_3(%arg0: i32, %arg1: i32) -> (i32, i32) {
    %c0_i32 = arith.constant 0 : i32
    %c0_i32_0 = arith.constant 0 : i32
    return %c0_i32, %arg0 : i32, i32
  }
}

</mosaic_0001>

<bundles_post_ra>
// kernel: apollo_forward.6
= control target key start
LH: loop header
LB: loop body
LE: loop exit
PB: predicated region body
PF: predicated region fallthrough
CT: control target
= control target key end

     0   :  { %v194_v0 = vmov 0.0   ;;  %vm195_vm0 = vmmov 0   ;;  %s249_s1 = inlined_call_operand.vmem [shape: bf16[128,128], index: 1, kind: input, shape index: {}]   ;;  %s250_s0 = inlined_call_operand.vmem [shape: bf16[8,128], index: 0, kind: input, shape index: {}]   ;;  %s251_s2 = inlined_call_operand.vmem [shape: f32[1,128], index: 2, kind: input, shape index: {}]   ;;  %s252_s3 = inlined_call_operand.vmem [shape: f32[8,128], index: 3, kind: output, shape index: {}]  }
   0x1   :  { %164 = vmatprep.subr.bf16.mxu0 %v194_v0  ;;  %v186_v1 = vld [vmem:[%s249_s1] sm:$0xff]   ;;  %180 = vmatprep.mubr.msk.bf16.mxu0 %vm195_vm0, %v194_v0  ;;  %v187_v2 = vld [vmem:[%s249_s1 + $0x8] sm:$0xff]   ;;  %v188_v3 = vld [vmem:[%s249_s1 + $0x10] sm:$0xff]  }
   0x2   :  { %165 = vmatpush3.bf16.msra.mxu0 %v186_v1  ;;  %v189_v4 = vld [vmem:[%s249_s1 + $0x18] sm:$0xff]   ;;  %v190_v5 = vld [vmem:[%s249_s1 + $0x20] sm:$0xff]   ;;  %v191_v6 = vld [vmem:[%s249_s1 + $0x28] sm:$0xff]  }
   0x3   :  { %166 = vmatprep.subr.bf16.mxu0 %v194_v0  ;;  %v192_v7 = vld [vmem:[%s249_s1 + $0x30] sm:$0xff]   ;;  %v193_v8 = vld [vmem:[%s249_s1 + $0x38] sm:$0xff]   ;;  %v21_v9 = vld [vmem:[%s250_s0] sm:$0xf] }
   0x4   :  { %v154_v11 = vld [vmem:[%s251_s2] ss:$0 sm:$0xff] }
   0x6   :  { %167 = vmatpush3.bf16.msra.mxu0 %v187_v2 }
   0x7   :  { %168 = vmatprep.subr.bf16.mxu0 %v194_v0 }
   0xa   :  { %169 = vmatpush3.bf16.msra.mxu0 %v188_v3 }
   0xb   :  { %170 = vmatprep.subr.bf16.mxu0 %v194_v0 }
   0xe   :  { %171 = vmatpush3.bf16.msra.mxu0 %v189_v4 }
   0xf   :  { %172 = vmatprep.subr.bf16.mxu0 %v194_v0 }
  0x12   :  { %173 = vmatpush3.bf16.msra.mxu0 %v190_v5 }
  0x13   :  { %174 = vmatprep.subr.bf16.mxu0 %v194_v0 }
  0x16   :  { %175 = vmatpush3.bf16.msra.mxu0 %v191_v6 }
  0x17   :  { %176 = vmatprep.subr.bf16.mxu0 %v194_v0 }
  0x1a   :  { %177 = vmatpush3.bf16.msra.mxu0 %v192_v7 }
  0x1b   :  { %178 = vmatprep.subr.bf16.mxu0 %v194_v0 }
  0x1e   :  { %179 = vmatpush3.bf16.msra.mxu0 %v193_v8 }
  0x21   :  { %181 = vmatmul.mubr.bf16.vlgmr.msra.gmra.mrb[0].mxu0 %v21_v9 }
  0xf4   :  { %v120_v10 = vpop.f32.mrb[0].mxu0 }
  0xf5   :  { %v182_v12 = vpop.f32.mrb[1].mxu0  ;;  %v139_v14 = vadd.f32 %v154_v11, %v120_v10 }
  0xf6   :  { %v123_v13 = vpop.f32.mrb[2].mxu0 }
  0xf7   :  { %v183_v15 = vpop.f32.mrb[3].mxu0  ;;  %v140_v16 = vmax.f32 %v139_v14, 0.0 }
  0xf9   :  { %141 = vst [vmem:[%s252_s3] sm:$0xff] %v140_v16 }

// kernel: apollo_forward.4
= control target key start
LH: loop header
LB: loop body
LE: loop exit
PB: predicated region body
PF: predicated region fallthrough
CT: control target
= control target key end

     0   :  { %8 = vsyncpa [#allocation3], 0  ;;  %s1021_s12 = smov [#allocation2]   ;;  %s1074_s0 = inlined_call_operand.vmem [shape: bf16[8,1024], index: 0, kind: input, shape index: {}]   ;;  %s1075_s1 = inlined_call_operand.hbm [shape: bf16[1024,128], index: 1, kind: input, shape index: {}]   ;;  %s1076_s2 = inlined_call_operand.vmem [shape: f32[1,128], index: 2, kind: input, shape index: {}]   ;;  %s1077_s3 = inlined_call_operand.vmem [shape: f32[8,128], index: 3, kind: output, shape index: {}]  }
   0x1   :  { %s16_s13 = sshll.u32 %s1021_s12, 4  ;;  %s997_s16 = scalar_lea.hbm %s1075_s1, 8192  ;;  %s17_s13 = int_to_ptr.vmem [resolvable:$true] %s16_s13 }
   0x2   :  { %p998_p0 = scmp.ne.s32.totalorder %s1075_s1, %s997_s16  ;;  %p1001_p1 = scmp.lt.u32.totalorder %s997_s16, %s1075_s1 }
   0x4   :  { %p1003_p2 = pnand %p1001_p1, %p998_p0 }
   0x6   :  { %1006 = shalt.err (!%p1003_p2)
}
   0x7   :  { %s1007_s21 = scalar_lea.vmem %s17_s13, 8192  ;;  %p1012_p4 = scmp.lt.s32.totalorder %s17_s13, %s17_s13 }
   0x8   :  { %p1008_p3 = scmp.ne.s32.totalorder %s17_s13, %s1007_s21  ;;  %p1013_p5 = scmp.lt.s32.totalorder %s1007_s21, %s1007_s21 }
   0xa   :  { %p1014_p6 = por %p1013_p5, %p1012_p4 }
   0xc   :  { %p1015_p7 = pnand %p1014_p6, %p1008_p3 }
   0xe   :  { %1018 = shalt.err (!%p1015_p7)
}
   0xf   :  { %s1022_s22 = smov 64   ;;  %s1023_s23 = smov 4  }
  0x10   :  { %22 = dma.hbm_to_vmem [thread:$0]  %s1075_s1, 8192, %s17_s13, [#allocation3], %s1022_s22, %s1022_s22, %s1023_s23  }
  0x11   :  { %1019 = dma.done.wait [#allocation3], 8192  }
  0x12   :  { %1020 = vsyncadd [#allocation3], 4294959104  ;;  %v925_v0 = vld [vmem:[#allocation2 + $0x40] sm:$0xff]   ;;  %v929_v4 = vld [vmem:[#allocation2 + $0x48] sm:$0xff]  }
  0x13   :  { %v926_v1 = vld [vmem:[#allocation2 + $0xc0] sm:$0xff]   ;;  %833 = vmatprep.subr.bf16.mxu0 %v925_v0  ;;  %v930_v5 = vld [vmem:[#allocation2 + $0xc8] sm:$0xff]   ;;  %v933_v8 = vld [vmem:[#allocation2 + $0x50] sm:$0xff]  }
  0x14   :  { %v927_v2 = vld [vmem:[#allocation2] sm:$0xff]   ;;  %855 = vmatprep.subr.bf16.mxu1 %v926_v1  ;;  %v931_v6 = vld [vmem:[#allocation2 + $0x8] sm:$0xff]   ;;  %v934_v9 = vld [vmem:[#allocation2 + $0xd0] sm:$0xff]  }
  0x15   :  { %v928_v3 = vld [vmem:[#allocation2 + $0x80] sm:$0xff]   ;;  %834 = vmatpush3.bf16.msra.mxu0 %v927_v2  ;;  %v932_v7 = vld [vmem:[#allocation2 + $0x88] sm:$0xff]   ;;  %v935_v10 = vld [vmem:[#allocation2 + $0x10] sm:$0xff]  }
  0x16   :  { %856 = vmatpush3.bf16.msra.mxu1 %v928_v3  ;;  %835 = vmatprep.subr.bf16.mxu0 %v929_v4  ;;  %v936_v11 = vld [vmem:[#allocation2 + $0x90] sm:$0xff]   ;;  %v937_v12 = vld [vmem:[#allocation2 + $0x58] sm:$0xff]   ;;  %v941_v16 = vld [vmem:[#allocation2 + $0x60] sm:$0xff]  }
  0x17   :  { %857 = vmatprep.subr.bf16.mxu1 %v930_v5  ;;  %v938_v13 = vld [vmem:[#allocation2 + $0xd8] sm:$0xff]   ;;  %v942_v17 = vld [vmem:[#allocation2 + $0xe0] sm:$0xff]   ;;  %v945_v20 = vld [vmem:[#allocation2 + $0x68] sm:$0xff]  }
  0x18   :  { %v939_v14 = vld [vmem:[#allocation2 + $0x18] sm:$0xff]   ;;  %v943_v18 = vld [vmem:[#allocation2 + $0x20] sm:$0xff]   ;;  %v946_v21 = vld [vmem:[#allocation2 + $0xe8] sm:$0xff]  }
  0x19   :  { %836 = vmatpush3.bf16.msra.mxu0 %v931_v6  ;;  %v940_v15 = vld [vmem:[#allocation2 + $0x98] sm:$0xff]   ;;  %v944_v19 = vld [vmem:[#allocation2 + $0xa0] sm:$0xff]   ;;  %v947_v22 = vld [vmem:[#allocation2 + $0x28] sm:$0xff]  }
  0x1a   :  { %858 = vmatpush3.bf16.msra.mxu1 %v932_v7  ;;  %837 = vmatprep.subr.bf16.mxu0 %v933_v8  ;;  %v948_v23 = vld [vmem:[#allocation2 + $0xa8] sm:$0xff]   ;;  %v949_v24 = vld [vmem:[#allocation2 + $0x70] sm:$0xff]   ;;  %v953_v28 = vld [vmem:[#allocation2 + $0x78] sm:$0xff]  }
  0x1b   :  { %859 = vmatprep.subr.bf16.mxu1 %v934_v9  ;;  %v950_v25 = vld [vmem:[#allocation2 + $0xf0] sm:$0xff]   ;;  %v954_v29 = vld [vmem:[#allocation2 + $0xf8] sm:$0xff]   ;;  %v35_v32 = vld [vmem:[%s1074_s0] sm:$0xff] }
  0x1c   :  { %v951_v26 = vld [vmem:[#allocation2 + $0x30] sm:$0xff]   ;;  %v955_v30 = vld [vmem:[#allocation2 + $0x38] sm:$0xff]   ;;  %v36_v33 = vld [vmem:[%s1074_s0 + $0x8] sm:$0xff]  ;;  %v760_v34 = vcombine.low %v35_v32, %v35_v32  ;;  %v761_v35 = vcombine.high %v35_v32, %v35_v32 }
  0x1d   :  { %838 = vmatpush3.bf16.msra.mxu0 %v935_v10  ;;  %v952_v27 = vld [vmem:[#allocation2 + $0xb0] sm:$0xff]   ;;  %v956_v31 = vld [vmem:[#allocation2 + $0xb8] sm:$0xff]   ;;  %v762_v36 = vcombine.low %v36_v33, %v36_v33  ;;  %v763_v37 = vcombine.high %v36_v33, %v36_v33  ;;  %v961_v38 = vld [vmem:[#allocation2 + $0x140] sm:$0xff]  }
  0x1e   :  { %860 = vmatpush3.bf16.msra.mxu1 %v936_v11  ;;  %839 = vmatprep.subr.bf16.mxu0 %v937_v12  ;;  %v962_v39 = vld [vmem:[#allocation2 + $0x1c0] sm:$0xff]   ;;  %v965_v42 = vld [vmem:[#allocation2 + $0x148] sm:$0xff]   ;;  %v969_v46 = vld [vmem:[#allocation2 + $0x150] sm:$0xff]  }
  0x1f   :  { %861 = vmatprep.subr.bf16.mxu1 %v938_v13  ;;  %611 = vmatprep.mubr.bf16.mxu0 %v761_v35  ;;  %v963_v40 = vld [vmem:[#allocation2 + $0x100] sm:$0xff]   ;;  %v966_v43 = vld [vmem:[#allocation2 + $0x1c8] sm:$0xff]   ;;  %v970_v47 = vld [vmem:[#allocation2 + $0x1d0] sm:$0xff]  }
  0x20   :  { %651 = vmatprep.mubr.bf16.mxu1 %v763_v37  ;;  %v964_v41 = vld [vmem:[#allocation2 + $0x180] sm:$0xff]   ;;  %v967_v44 = vld [vmem:[#allocation2 + $0x108] sm:$0xff]   ;;  %v971_v48 = vld [vmem:[#allocation2 + $0x110] sm:$0xff]  }
  0x21   :  { %840 = vmatpush3.bf16.msra.mxu0 %v939_v14  ;;  %v968_v45 = vld [vmem:[#allocation2 + $0x188] sm:$0xff]   ;;  %v972_v49 = vld [vmem:[#allocation2 + $0x190] sm:$0xff]   ;;  %v973_v50 = vld [vmem:[#allocation2 + $0x158] sm:$0xff]  }
  0x22   :  { %862 = vmatpush3.bf16.msra.mxu1 %v940_v15  ;;  %841 = vmatprep.subr.bf16.mxu0 %v941_v16  ;;  %v974_v51 = vld [vmem:[#allocation2 + $0x1d8] sm:$0xff]   ;;  %v977_v54 = vld [vmem:[#allocation2 + $0x160] sm:$0xff]   ;;  %v981_v58 = vld [vmem:[#allocation2 + $0x168] sm:$0xff]  }
  0x23   :  { %863 = vmatprep.subr.bf16.mxu1 %v942_v17  ;;  %v975_v52 = vld [vmem:[#allocation2 + $0x118] sm:$0xff]   ;;  %v978_v55 = vld [vmem:[#allocation2 + $0x1e0] sm:$0xff]   ;;  %v982_v59 = vld [vmem:[#allocation2 + $0x1e8] sm:$0xff]  }
  0x24   :  { %v976_v53 = vld [vmem:[#allocation2 + $0x198] sm:$0xff]   ;;  %v979_v56 = vld [vmem:[#allocation2 + $0x120] sm:$0xff]   ;;  %v983_v60 = vld [vmem:[#allocation2 + $0x128] sm:$0xff]  }
  0x25   :  { %842 = vmatpush3.bf16.msra.mxu0 %v943_v18  ;;  %v980_v57 = vld [vmem:[#allocation2 + $0x1a0] sm:$0xff]   ;;  %v984_v61 = vld [vmem:[#allocation2 + $0x1a8] sm:$0xff]   ;;  %v985_v62 = vld [vmem:[#allocation2 + $0x170] sm:$0xff]  }
  0x26   :  { %864 = vmatpush3.bf16.msra.mxu1 %v944_v19  ;;  %843 = vmatprep.subr.bf16.mxu0 %v945_v20  ;;  %v986_v63 = vld [vmem:[#allocation2 + $0x1f0] sm:$0xff]   ;;  %v989_v2 = vld [vmem:[#allocation2 + $0x178] sm:$0xff]   ;;  %v832_v35 = vld [vmem:[%s1076_s2] ss:$0 sm:$0xff] }
  0x27   :  { %865 = vmatprep.subr.bf16.mxu1 %v946_v21  ;;  %v987_v0 = vld [vmem:[#allocation2 + $0x130] sm:$0xff]   ;;  %v990_v3 = vld [vmem:[#allocation2 + $0x1f8] sm:$0xff]  }
  0x28   :  { %v988_v1 = vld [vmem:[#allocation2 + $0x1b0] sm:$0xff]   ;;  %v991_v4 = vld [vmem:[#allocation2 + $0x138] sm:$0xff]  }
  0x29   :  { %844 = vmatpush3.bf16.msra.mxu0 %v947_v22  ;;  %v992_v5 = vld [vmem:[#allocation2 + $0x1b8] sm:$0xff]   ;;  %v37_v6 = vld [vmem:[%s1074_s0 + $0x10] sm:$0xff] }
  0x2a   :  { %866 = vmatpush3.bf16.msra.mxu1 %v948_v23  ;;  %845 = vmatprep.subr.bf16.mxu0 %v949_v24  ;;  %v764_v7 = vcombine.low %v37_v6, %v37_v6  ;;  %v765_v8 = vcombine.high %v37_v6, %v37_v6  ;;  %v38_v9 = vld [vmem:[%s1074_s0 + $0x18] sm:$0xff] }
  0x2b   :  { %867 = vmatprep.subr.bf16.mxu1 %v950_v25  ;;  %v766_v10 = vcombine.low %v38_v9, %v38_v9  ;;  %v767_v11 = vcombine.high %v38_v9, %v38_v9 }
  0x2d   :  { %846 = vmatpush3.bf16.msra.mxu0 %v951_v26 }
  0x2e   :  { %868 = vmatpush3.bf16.msra.mxu1 %v952_v27  ;;  %847 = vmatprep.subr.bf16.mxu0 %v953_v28 }
  0x2f   :  { %869 = vmatprep.subr.bf16.mxu1 %v954_v29 }
  0x31   :  { %848 = vmatpush3.bf16.msra.mxu0 %v955_v30 }
  0x32   :  { %870 = vmatpush3.bf16.msra.mxu1 %v956_v31  ;;  %877 = vmatprep.subr.bf16.mxu0 %v961_v38 }
  0x33   :  { %899 = vmatprep.subr.bf16.mxu1 %v962_v39 }
  0x34   :  { %612 = vmatmul.mubr.bf16.vlgmr.msra.gmra.mrb[0].mxu0 %v760_v34 }
  0x35   :  { %652 = vmatmul.mubr.bf16.vlgmr.msra.gmra.mrb[0].mxu1 %v762_v36  ;;  %878 = vmatpush3.bf16.msra.mxu0 %v963_v40 }
  0x36   :  { %900 = vmatpush3.bf16.msra.mxu1 %v964_v41  ;;  %879 = vmatprep.subr.bf16.mxu0 %v965_v42 }
  0x37   :  { %901 = vmatprep.subr.bf16.mxu1 %v966_v43  ;;  %691 = vmatprep.mubr.bf16.mxu0 %v765_v8 }
  0x38   :  { %731 = vmatprep.mubr.bf16.mxu1 %v767_v11 }
  0x39   :  { %880 = vmatpush3.bf16.msra.mxu0 %v967_v44 }
  0x3a   :  { %902 = vmatpush3.bf16.msra.mxu1 %v968_v45  ;;  %881 = vmatprep.subr.bf16.mxu0 %v969_v46 }
  0x3b   :  { %903 = vmatprep.subr.bf16.mxu1 %v970_v47 }
  0x3d   :  { %882 = vmatpush3.bf16.msra.mxu0 %v971_v48 }
  0x3e   :  { %904 = vmatpush3.bf16.msra.mxu1 %v972_v49  ;;  %883 = vmatprep.subr.bf16.mxu0 %v973_v50 }
  0x3f   :  { %905 = vmatprep.subr.bf16.mxu1 %v974_v51 }
  0x41   :  { %884 = vmatpush3.bf16.msra.mxu0 %v975_v52 }
  0x42   :  { %906 = vmatpush3.bf16.msra.mxu1 %v976_v53  ;;  %885 = vmatprep.subr.bf16.mxu0 %v977_v54 }
  0x43   :  { %907 = vmatprep.subr.bf16.mxu1 %v978_v55 }
  0x45   :  { %886 = vmatpush3.bf16.msra.mxu0 %v979_v56 }
  0x46   :  { %908 = vmatpush3.bf16.msra.mxu1 %v980_v57  ;;  %887 = vmatprep.subr.bf16.mxu0 %v981_v58 }
  0x47   :  { %909 = vmatprep.subr.bf16.mxu1 %v982_v59 }
  0x49   :  { %888 = vmatpush3.bf16.msra.mxu0 %v983_v60 }
  0x4a   :  { %910 = vmatpush3.bf16.msra.mxu1 %v984_v61  ;;  %889 = vmatprep.subr.bf16.mxu0 %v985_v62 }
  0x4b   :  { %911 = vmatprep.subr.bf16.mxu1 %v986_v63 }
  0x4d   :  { %890 = vmatpush3.bf16.msra.mxu0 %v987_v0 }
  0x4e   :  { %912 = vmatpush3.bf16.msra.mxu1 %v988_v1  ;;  %891 = vmatprep.subr.bf16.mxu0 %v989_v2 }
  0x4f   :  { %913 = vmatprep.subr.bf16.mxu1 %v990_v3 }
  0x51   :  { %892 = vmatpush3.bf16.msra.mxu0 %v991_v4 }
  0x52   :  { %914 = vmatpush3.bf16.msra.mxu1 %v992_v5 }
  0x54   :  { %692 = vmatmul.mubr.bf16.vlgmr.msra.gmra.mrb[4].mxu0 %v764_v7 }
  0x55   :  { %732 = vmatmul.mubr.bf16.vlgmr.msra.gmra.mrb[4].mxu1 %v766_v10 }
 0x107   :  { %v849_v12 = vpop.f32.mrb[0].mxu0 }
 0x108   :  { %v871_v13 = vpop.f32.mrb[0].mxu1  ;;  %v850_v14 = vpop.f32.mrb[1].mxu0 }
 0x109   :  { %v872_v15 = vpop.f32.mrb[1].mxu1  ;;  %v851_v16 = vadd.f32 %v850_v14, %v849_v12  ;;  %v852_v18 = vpop.f32.mrb[2].mxu0 }
 0x10a   :  { %v873_v17 = vadd.f32 %v872_v15, %v871_v13  ;;  %v874_v19 = vpop.f32.mrb[2].mxu1  ;;  %v853_v20 = vpop.f32.mrb[3].mxu0 }
 0x10b   :  { %v875_v21 = vpop.f32.mrb[3].mxu1 }
 0x10c   :  { %v654_v22 = vadd.f32 %v873_v17, %v851_v16 }
 0x127   :  { %v893_v23 = vpop.f32.mrb[4].mxu0 }
 0x128   :  { %v915_v24 = vpop.f32.mrb[4].mxu1  ;;  %v894_v25 = vpop.f32.mrb[5].mxu0 }
 0x129   :  { %v916_v26 = vpop.f32.mrb[5].mxu1  ;;  %v895_v27 = vadd.f32 %v894_v25, %v893_v23  ;;  %v896_v29 = vpop.f32.mrb[6].mxu0 }
 0x12a   :  { %v917_v28 = vadd.f32 %v916_v26, %v915_v24  ;;  %v918_v30 = vpop.f32.mrb[6].mxu1  ;;  %v897_v31 = vpop.f32.mrb[7].mxu0 }
 0x12b   :  { %v919_v32 = vpop.f32.mrb[7].mxu1  ;;  %v694_v33 = vadd.f32 %v895_v27, %v654_v22 }
 0x12d   :  { %v734_v34 = vadd.f32 %v917_v28, %v694_v33 }
 0x12f   :  { %v752_v36 = vadd.f32 %v832_v35, %v734_v34 }
 0x131   :  { %v753_v37 = vmax.f32 %v752_v36, 0.0 }
 0x133   :  { %754 = vst [vmem:[%s1077_s3] sm:$0xff] %v753_v37 }
 0x134   :  { %759 = vsyncpa [#allocation3], 1 }

// kernel: apollo_forward.5
= control target key start
LH: loop header
LB: loop body
LE: loop exit
PB: predicated region body
PF: predicated region fallthrough
CT: control target
= control target key end

     0   :  { %s1392_s17 = smov 0   ;;  %s1548_s0 = inlined_call_operand.vmem [shape: f32[8,128], index: 0, kind: input, shape index: {}]   ;;  %s1549_s1 = inlined_call_operand.vmem [shape: bf16[2,128,128], index: 1, kind: input, shape index: {}]   ;;  %s1550_s2 = inlined_call_operand.vmem [shape: f32[2,1,128], index: 2, kind: input, shape index: {}]   ;;  %s1551_s3 = inlined_call_operand.vmem [shape: f32[2,1,128], index: 3, kind: input, shape index: {}, may-alias: {3,9}]   ;;  %s1552_s4 = inlined_call_operand.vmem [shape: f32[2,1,128], index: 4, kind: input, shape index: {}, may-alias: {4,10}]   ;;  %s1553_s5 = inlined_call_operand.vmem [shape: bf16[2,128,256], index: 5, kind: input, shape index: {}]   ;;  %s1554_s6 = inlined_call_operand.vmem [shape: f32[2,1,256], index: 6, kind: input, shape index: {}]   ;;  %s1555_s7 = inlined_call_operand.vmem [shape: bf16[2,256,128], index: 7, kind: input, shape index: {}]   ;;  %s1556_s8 = inlined_call_operand.vmem [shape: f32[2,1,128], index: 8, kind: input, shape index: {}]   ;;  %s1557_s9 = inlined_call_operand.vmem [shape: f32[2,1,128], index: 9, kind: input, shape index: {}, may-alias: {3,9}]   ;;  %s1558_s10 = inlined_call_operand.vmem [shape: f32[2,1,128], index: 10, kind: input, shape index: {}, may-alias: {4,10}]   ;;  %s1559_s11 = inlined_call_operand.vmem [shape: f32[8,128], index: 11, kind: output, shape index: {}]  }
   0x1   :  { %1561 = sst [smem:[#allocation3_spill]] %s1549_s1 }
   0x2   :  { %1562 = sst [smem:[#allocation4_spill]] %s1553_s5 }
   0x3 LB: > { %1563 = sst [smem:[#allocation2_spill]] %s1327_s17  ;;  %s1144_s18 = sadd.s32 4294967295, %s1327_s17   ;;  %s1327_s17 = sphi %s1392_s17, %s21_s17  }
   0x4   : > { %p1147_p0 = scmp.ge.s32.totalorder %s1327_s17, 1  ;;  %p409_p1 = scmp.lt.s32.totalorder %s1327_s17, 3 }
   0x6   : > { %p410_p2 = pnand %p1147_p0, %p409_p1 }
   0x7   : > { %p476_p3 = scmp.lt.s32.totalorder (!%p410_p2), %s1144_s18, 1  ;;  %s1564_s1 = sld [smem:[#allocation3_spill]] (!%p410_p2) }
   0x8   : > { %413 = sbr.rel (%p410_p2) target bundleno = 1340 (0x53c), region = 64  ;;  %s1565_s5 = sld [smem:[#allocation4_spill]] (!%p410_p2) }
   0x9   : > { %p1155_p4 = scmp.ne.s32.totalorder (!%p410_p2), %s1144_s18, 0 }
   0xf   : > { %s1400_s19 = scalar_select %p476_p3, %s1144_s18, 1 }
  0x10   : > { %517 = sbr.rel (%p1155_p4) target bundleno = 23 (0x17), region = 68  ;;  %v518_v0 = vld [vmem:[%s1548_s0] sm:$0xff] (!%p1155_p4) }
  0x11   : > { %s1204_s20 = sshll.u32 %s1400_s19, 6  ;;  %s1205_s14 = sshll.u32 %s1400_s19, 7  ;;  %519 = vst [vmem:[%s1559_s11] sm:$0xff] (!%p1155_p4), %v518_v0 }
  0x12   : > { %s1410_s26 = scalar_lea.vmem %s1564_s1, %s1204_s20  ;;  %s1424_s17 = scalar_lea.vmem %s1565_s5, %s1205_s14 }
  0x13   : > { %s1152_s21 = sshll.u32 %s1400_s19, 1  ;;  %s1435_s27 = scalar_lea.vmem %s1555_s7, %s1205_s14 }
  0x14   : > { %s1430_s20 = scalar_lea.vmem %s1554_s6, %s1152_s21  ;;  %s506_s12 = scalar_lea.vmem %s1556_s8, %s1400_s19 }
  0x15   : > { %s509_s15 = scalar_lea.vmem %s1557_s9, %s1400_s19  ;;  %s512_s5 = scalar_lea.vmem %s1558_s10, %s1400_s19 }
  0x17 PF: > { %v1269_v1 = vld [vmem:[%s1410_s26] sm:$0xff]   ;;  %v1329_v2 = vmov 0.0   ;;  %v1270_v3 = vld [vmem:[%s1410_s26 + $0x8] sm:$0xff]   ;;  %vm1330_vm0 = vmmov 0   ;;  %v1271_v4 = vld [vmem:[%s1410_s26 + $0x10] sm:$0xff]   ;;  %v636_v12 = vlaneseq  ;;  %s1566_s24 = scalar_lea.vmem %s1550_s2, %s1400_s19  ;;  %v1331_v38 = vmov 0   ;;  %s1567_s25 = scalar_lea.vmem %s1551_s3, %s1400_s19 }
  0x18   : > { %1238 = vmatprep.subr.bf16.mxu0 %v1329_v2  ;;  %1254 = vmatprep.mubr.msk.bf16.mxu0 %vm1330_vm0, %v1329_v2  ;;  %v1272_v5 = vld [vmem:[%s1410_s26 + $0x18] sm:$0xff]   ;;  %v1273_v6 = vld [vmem:[%s1410_s26 + $0x20] sm:$0xff]   ;;  %v1274_v7 = vld [vmem:[%s1410_s26 + $0x28] sm:$0xff]   ;;  %s1568_s16 = scalar_lea.vmem %s1552_s4, %s1400_s19 }
  0x19   : > { %1239 = vmatpush3.bf16.msra.mxu0 %v1269_v1  ;;  %v1275_v8 = vld [vmem:[%s1410_s26 + $0x30] sm:$0xff]   ;;  %v1276_v9 = vld [vmem:[%s1410_s26 + $0x38] sm:$0xff]   ;;  %v520_v10 = vld [vmem:[%s1559_s11] sm:$0xff]  ;;  %v1472_v14 = vand.u32 127, %v636_v12  ;;  %807 = vmatprep.mubr.bf16.mxu1 %v1331_v38 }
  0x1a   : > { %1240 = vmatprep.subr.bf16.mxu0 %v1329_v2  ;;  %v521_v11 = vpack.c.bf16 %v520_v10, %v520_v10  ;;  %v1156_v13 = vld [vmem:[%s1566_s24] ss:$0 sm:$0xff]  ;;  %v1277_v22 = vld [vmem:[%s1424_s17 + $0x4] ss:$8 sps:$4 sm:$0xff]   ;;  %v1280_v24 = vld [vmem:[%s1424_s17 + $0x14] ss:$8 sps:$4 sm:$0xff]  }
  0x1b   : > { %vm638_vm1 = vcmp.lt.s32.totalorder %v1472_v14, 64  ;;  %v1279_v23 = vld [vmem:[%s1424_s17] ss:$8 sps:$4 sm:$0xff]   ;;  %775 = vmatprep.subr.bf16.mxu1 %v1277_v22  ;;  %v1282_v25 = vld [vmem:[%s1424_s17 + $0x10] ss:$8 sps:$4 sm:$0xff]  }
  0x1c   : > { %776 = vmatpush1.bf16.msra.mxu1 %v1279_v23  ;;  %v1283_v26 = vld [vmem:[%s1424_s17 + $0x24] ss:$8 sps:$4 sm:$0xff]   ;;  %v1285_v32 = vld [vmem:[%s1424_s17 + $0x20] ss:$8 sps:$4 sm:$0xff]   ;;  %v1286_v33 = vld [vmem:[%s1424_s17 + $0x34] ss:$8 sps:$4 sm:$0xff]  }
  0x1d   : > { %1241 = vmatpush3.bf16.msra.mxu0 %v1270_v3  ;;  %777 = vmatprep.subr.bf16.mxu1 %v1280_v24  ;;  %v1288_v34 = vld [vmem:[%s1424_s17 + $0x30] ss:$8 sps:$4 sm:$0xff]   ;;  %v1289_v35 = vld [vmem:[%s1424_s17 + $0x44] ss:$8 sps:$4 sm:$0xff]   ;;  %v1291_v36 = vld [vmem:[%s1424_s17 + $0x40] ss:$8 sps:$4 sm:$0xff]  }
  0x1e   : > { %1242 = vmatprep.subr.bf16.mxu0 %v1329_v2  ;;  %v1292_v37 = vld [vmem:[%s1424_s17 + $0x54] ss:$8 sps:$4 sm:$0xff]   ;;  %v1294_v39 = vld [vmem:[%s1424_s17 + $0x50] ss:$8 sps:$4 sm:$0xff]   ;;  %v1295_v40 = vld [vmem:[%s1424_s17 + $0x64] ss:$8 sps:$4 sm:$0xff]  }
  0x1f   : > { %v1297_v41 = vld [vmem:[%s1424_s17 + $0x60] ss:$8 sps:$4 sm:$0xff]   ;;  %v1298_v42 = vld [vmem:[%s1424_s17 + $0x74] ss:$8 sps:$4 sm:$0xff]   ;;  %v1300_v43 = vld [vmem:[%s1424_s17 + $0x70] ss:$8 sps:$4 sm:$0xff]  }
  0x20   : > { %778 = vmatpush1.bf16.msra.mxu1 %v1282_v25  ;;  %v1301_v44 = vld [vmem:[%s1435_s27 + $0x40] sm:$0xff]   ;;  %v1303_v46 = vld [vmem:[%s1435_s27 + $0x48] sm:$0xff]   ;;  %v1305_v48 = vld [vmem:[%s1435_s27 + $0x50] sm:$0xff]  }
  0x21   : > { %1243 = vmatpush3.bf16.msra.mxu0 %v1271_v4  ;;  %779 = vmatprep.subr.bf16.mxu1 %v1283_v26  ;;  %v1302_v45 = vld [vmem:[%s1435_s27] sm:$0xff]   ;;  %v1304_v47 = vld [vmem:[%s1435_s27 + $0x8] sm:$0xff]   ;;  %v1306_v49 = vld [vmem:[%s1435_s27 + $0x10] sm:$0xff]  }
  0x22   : > { %1244 = vmatprep.subr.bf16.mxu0 %v1329_v2  ;;  %v1307_v50 = vld [vmem:[%s1435_s27 + $0x58] sm:$0xff]   ;;  %v1309_v52 = vld [vmem:[%s1435_s27 + $0x60] sm:$0xff]   ;;  %v1311_v54 = vld [vmem:[%s1435_s27 + $0x68] sm:$0xff]  }
  0x23   : > { %v1308_v51 = vld [vmem:[%s1435_s27 + $0x18] sm:$0xff]   ;;  %v1310_v53 = vld [vmem:[%s1435_s27 + $0x20] sm:$0xff]   ;;  %v1312_v55 = vld [vmem:[%s1435_s27 + $0x28] sm:$0xff]  }
  0x24   : > { %780 = vmatpush1.bf16.msra.mxu1 %v1285_v32  ;;  %v1165_v60 = vld [vmem:[%s1567_s25] ss:$0 sm:$0xff]  ;;  %v1314_v3 = vld [vmem:[%s1435_s27 + $0x30] sm:$0xff]   ;;  %v1315_v4 = vld [vmem:[%s1435_s27 + $0x78] sm:$0xff]  }
  0x25   : > { %1245 = vmatpush3.bf16.msra.mxu0 %v1272_v5  ;;  %781 = vmatprep.subr.bf16.mxu1 %v1286_v33  ;;  %v1166_v62 = vld [vmem:[%s1568_s16] ss:$0 sm:$0xff]  ;;  %v1316_v5 = vld [vmem:[%s1435_s27 + $0x38] sm:$0xff]  }
  0x26   : > { %1246 = vmatprep.subr.bf16.mxu0 %v1329_v2 }
  0x28   : > { %782 = vmatpush1.bf16.msra.mxu1 %v1288_v34 }
  0x29   : > { %1247 = vmatpush3.bf16.msra.mxu0 %v1273_v6  ;;  %783 = vmatprep.subr.bf16.mxu1 %v1289_v35  ;;  %v686_v6 = vshrl.u32 %v636_v12, 7  ;;  %v1183_v12 = vld [vmem:[%s506_s12] ss:$0 sm:$0xff] }
  0x2a   : > { %1248 = vmatprep.subr.bf16.mxu0 %v1329_v2 }
  0x2c   : > { %784 = vmatpush1.bf16.msra.mxu1 %v1291_v36 }
  0x2d   : > { %1249 = vmatpush3.bf16.msra.mxu0 %v1274_v7  ;;  %785 = vmatprep.subr.bf16.mxu1 %v1292_v37  ;;  %v687_v7 = vsub.s32 0, %v686_v6 }
  0x2e   : > { %1250 = vmatprep.subr.bf16.mxu0 %v1329_v2 }
  0x30   : > { %786 = vmatpush1.bf16.msra.mxu1 %v1294_v39 }
  0x31   : > { %1251 = vmatpush3.bf16.msra.mxu0 %v1275_v8  ;;  %787 = vmatprep.subr.bf16.mxu1 %v1295_v40  ;;  %v683_v8 = vld [vmem:[%s1430_s20] sm:$0x3] }
  0x32   : > { %1252 = vmatprep.subr.bf16.mxu0 %v1329_v2  ;;  %v1313_v2 = vld [vmem:[%s1435_s27 + $0x70] sm:$0xff]  }
  0x34   : > { %788 = vmatpush1.bf16.msra.mxu1 %v1297_v41  ;;  %v1200_v41 = vld [vmem:[%s509_s15] ss:$0 sm:$0xff] }
  0x35   : > { %1253 = vmatpush3.bf16.msra.mxu0 %v1276_v9  ;;  %789 = vmatprep.subr.bf16.mxu1 %v1298_v42  ;;  %v691_v9 = vsub.s32 1, %v686_v6 }
  0x36   : > { %1216 = vmatprep.subr.bf16.mxu0 %v1301_v44 }
  0x38   : > { %1255 = vmatmul.mubr.bf16.vlgmr.msra.gmra.mrb[0].mxu0 %v521_v11  ;;  %790 = vmatpush1.bf16.msra.mxu1 %v1300_v43  ;;  %v692_v11 = vrot.slane %v683_v8, %v691_v9  ;;  %v1201_v43 = vld [vmem:[%s512_s5] ss:$0 sm:$0xff] }
  0x39   : > { %1217 = vmatpush3.bf16.msra.mxu0 %v1302_v45 }
  0x3a   : > { %1218 = vmatprep.subr.bf16.mxu0 %v1303_v46 }
  0x3d   : > { %1219 = vmatpush3.bf16.msra.mxu0 %v1304_v47 }
  0x3e   : > { %1220 = vmatprep.subr.bf16.mxu0 %v1305_v48 }
  0x41   : > { %1221 = vmatpush3.bf16.msra.mxu0 %v1306_v49 }
  0x42   : > { %1222 = vmatprep.subr.bf16.mxu0 %v1307_v50 }
  0x45   : > { %1223 = vmatpush3.bf16.msra.mxu0 %v1308_v51 }
  0x46   : > { %1224 = vmatprep.subr.bf16.mxu0 %v1309_v52 }
  0x49   : > { %1225 = vmatpush3.bf16.msra.mxu0 %v1310_v53 }
  0x4a   : > { %1226 = vmatprep.subr.bf16.mxu0 %v1311_v54 }
  0x4d   : > { %1227 = vmatpush3.bf16.msra.mxu0 %v1312_v55 }
  0x4e   : > { %1228 = vmatprep.subr.bf16.mxu0 %v1313_v2 }
  0x51   : > { %1229 = vmatpush3.bf16.msra.mxu0 %v1314_v3 }
  0x52   : > { %1230 = vmatprep.subr.bf16.mxu0 %v1315_v4 }
  0x55   : > { %1231 = vmatpush3.bf16.msra.mxu0 %v1316_v5 }
 0x10b   : > { %v627_v15 = vpop.f32.mrb[0].mxu0 }
 0x10c   : > { %v628_v16 = vadd.f32 %v1156_v13, %v627_v15  ;;  %v1256_v17 = vpop.f32.mrb[1].mxu0 }
 0x10d   : > { %v630_v18 = vpop.f32.mrb[2].mxu0 }
 0x10e   : > { %v1257_v19 = vpop.f32.mrb[3].mxu0  ;;  %v633_v20 = vadd.f32 %v628_v16, %v520_v10  ;;  %v688_v10 = vrot.slane %v683_v8, %v687_v7 }
 0x110   : > { %v639_v21 = vsel %vm638_vm1, %v633_v20, 0.0 }
 0x111   : > { %640 = vadd.xlane.f32.xlu0 %v639_v21 }
 0x19e   : > { %v641_v27 = vpop.xlane.xlu0 %640 }
 0x19f   : > { %v642_v28 = vmul.f32 0.015625, %v641_v27 }
 0x1a1   : > { %v643_v29 = vsub.f32 %v633_v20, %v642_v28 }
 0x1a3   : > { %v644_v30 = vsel %vm638_vm1, %v643_v29, 0.0 }
 0x1a4   : > { %v645_v31 = vmul.f32 %v644_v30, %v644_v30 }
 0x1a6   : > { %646 = vadd.xlane.f32.xlu0 %v645_v31 }
 0x233   : > { %v647_v56 = vpop.xlane.xlu0 %646 }
 0x234   : > { %v648_v57 = vmul.f32 0.015625, %v647_v56 }
 0x236   : > { %v649_v58 = vadd.f32 1e-05, %v648_v57 }
 0x238   : > { %1317 = vrsqrt.f32 %v649_v58 }
 0x242   : > { %v1318_v59 = vpop.eup %1317 }
 0x243   : > { %v651_v61 = vmul.f32 %v1318_v59, %v644_v30 }
 0x245   : > { %v658_v63 = vmul.f32 %v1165_v60, %v651_v61 }
 0x247   : > { %v665_v0 = vadd.f32 %v1166_v62, %v658_v63 }
 0x249   : > { %v666_v1 = vpack.c.bf16 %v665_v0, %v665_v0 }
 0x24b   : > { %808 = vmatmul.mubr.bf16.vlgmr.msra.gmra.mrb[0].mxu1 %v666_v1 }
 0x31e   : > { %v809_v13 = vpop.f32.mrb[0].mxu1 }
 0x31f   : > { %v810_v15 = vadd.f32 %v809_v13, %v688_v10  ;;  %v811_v16 = vpop.f32.mrb[1].mxu1 }
 0x320   : > { %v812_v17 = vadd.f32 %v811_v16, %v692_v11  ;;  %v813_v18 = vpop.f32.mrb[2].mxu1 }
 0x321   : > { %v816_v19 = vmax.f32 %v810_v15, 0.0  ;;  %v814_v20 = vpop.f32.mrb[3].mxu1 }
 0x322   : > { %v817_v21 = vmax.f32 %v812_v17, 0.0 }
 0x323   : > { %v818_v23 = vpack.c.bf16 %v816_v19, %v816_v19 }
 0x324   : > { %v819_v22 = vpack.c.bf16 %v817_v21, %v817_v21 }
 0x326   : > { %987 = vmatprep.mubr.bf16.mxu0 %v819_v22 }
 0x327   : > { %988 = vmatmul.mubr.bf16.vlgmr.msra.gmra.mrb[4].mxu0 %v818_v23 }
 0x3fa   : > { %v1232_v24 = vpop.f32.mrb[4].mxu0 }
 0x3fb   : > { %v1233_v25 = vpop.f32.mrb[5].mxu0 }
 0x3fc   : > { %v1234_v26 = vadd.f32 %v1233_v25, %v1232_v24  ;;  %v1235_v27 = vpop.f32.mrb[6].mxu0 }
 0x3fd   : > { %v1236_v28 = vpop.f32.mrb[7].mxu0 }
 0x3fe   : > { %v990_v29 = vadd.f32 %v1234_v26, %v1183_v12 }
 0x400   : > { %v995_v30 = vadd.f32 %v990_v29, %v665_v0 }
 0x402   : > { %v998_v31 = vsel %vm638_vm1, %v995_v30, 0.0 }
 0x403   : > { %999 = vadd.xlane.f32.xlu1 %v998_v31 }
 0x490   : > { %v1000_v32 = vpop.xlane.xlu1 %999 }
 0x491   : > { %v1001_v33 = vmul.f32 0.015625, %v1000_v32 }
 0x493   : > { %v1002_v34 = vsub.f32 %v995_v30, %v1001_v33 }
 0x495   : > { %v1003_v35 = vsel %vm638_vm1, %v1002_v34, 0.0 }
 0x496   : > { %v1004_v36 = vmul.f32 %v1003_v35, %v1003_v35 }
 0x498   : > { %1005 = vadd.xlane.f32.xlu1 %v1004_v36 }
 0x525   : > { %v1006_v37 = vpop.xlane.xlu1 %1005 }
 0x526   : > { %v1007_v38 = vmul.f32 0.015625, %v1006_v37 }
 0x528   : > { %v1008_v39 = vadd.f32 1e-05, %v1007_v38 }
 0x52a   : > { %1319 = vrsqrt.f32 %v1008_v39 }
 0x534   : > { %v1320_v40 = vpop.eup %1319 }
 0x535   : > { %v1010_v42 = vmul.f32 %v1320_v40, %v1003_v35 }
 0x537   : > { %v1017_v14 = vmul.f32 %v1200_v41, %v1010_v42 }
 0x539   : > { %v1024_v44 = vadd.f32 %v1201_v43, %v1017_v14 }
 0x53b   : > { %1025 = vst [vmem:[%s1559_s11] sm:$0xff] %v1024_v44 }
 0x53c PF: > { %s1569_s18 = sld [smem:[#allocation2_spill]] }
 0x542   : > { %s21_s17 = sadd.s32 1, %s1569_s18  }
 0x543   : > { %p18_p5 = scmp.ge.s32.totalorder %s21_s17, 4  }
 0x545   :  { %20 = sbr.rel (!%p18_p5) target bundleno = 3 (0x3), region = 121 }

// kernel: apollo_forward.7
= control target key start
LH: loop header
LB: loop body
LE: loop exit
PB: predicated region body
PF: predicated region fallthrough
CT: control target
= control target key end

     0   :  { %v763_v3 = vmov 0   ;;  %s1016_s1 = inlined_call_operand.vmem [shape: bf16[128,1024], index: 1, kind: input, shape index: {}]   ;;  %s1017_s0 = inlined_call_operand.vmem [shape: bf16[8,128], index: 0, kind: input, shape index: {}]   ;;  %s1018_s2 = inlined_call_operand.vmem [shape: f32[1,1024], index: 2, kind: input, shape index: {}]   ;;  %s1019_s3 = inlined_call_operand.vmem [shape: f32[8,1024], index: 3, kind: output, shape index: {}]  }
   0x1   :  { %v36_v0 = vld [vmem:[%s1016_s1] sm:$0xff]  ;;  %v37_v2 = vld [vmem:[%s1016_s1 + $0x8] sm:$0xff]  ;;  %452 = vmatprep.mubr.bf16.mxu0 %v763_v3  ;;  %493 = vmatprep.mubr.bf16.mxu1 %v763_v3  ;;  %v38_v63 = vld [vmem:[%s1016_s1 + $0x10] sm:$0xff] }
   0x2   :  { %v40_v1 = vld [vmem:[%s1016_s1 + $0x20] sm:$0xff]  ;;  %v41_v5 = vld [vmem:[%s1016_s1 + $0x28] sm:$0xff] }
   0x3   :  { %v682_v4 = vcombine.high %v36_v0, %v40_v1  ;;  %v681_v6 = vcombine.low %v36_v0, %v40_v1  ;;  %v44_v7 = vld [vmem:[%s1016_s1 + $0x40] sm:$0xff]  ;;  %v684_v9 = vcombine.high %v37_v2, %v41_v5  ;;  %v683_v10 = vcombine.low %v37_v2, %v41_v5  ;;  %v45_v12 = vld [vmem:[%s1016_s1 + $0x48] sm:$0xff]  ;;  %v42_v0 = vld [vmem:[%s1016_s1 + $0x30] sm:$0xff] }
   0x4   :  { %v48_v8 = vld [vmem:[%s1016_s1 + $0x60] sm:$0xff]  ;;  %v49_v13 = vld [vmem:[%s1016_s1 + $0x68] sm:$0xff]  ;;  %v39_v1 = vld [vmem:[%s1016_s1 + $0x18] sm:$0xff] }
   0x5   :  { %v690_v11 = vcombine.high %v44_v7, %v48_v8  ;;  %v52_v14 = vld [vmem:[%s1016_s1 + $0x80] sm:$0xff]  ;;  %420 = vmatprep.subr.bf16.mxu0 %v682_v4  ;;  %v692_v15 = vcombine.high %v45_v12, %v49_v13  ;;  %v53_v17 = vld [vmem:[%s1016_s1 + $0x88] sm:$0xff]  ;;  %461 = vmatprep.subr.bf16.mxu1 %v684_v9  ;;  %v689_v19 = vcombine.low %v44_v7, %v48_v8  ;;  %v43_v2 = vld [vmem:[%s1016_s1 + $0x38] sm:$0xff] }
   0x6   :  { %v56_v16 = vld [vmem:[%s1016_s1 + $0xa0] sm:$0xff]  ;;  %v57_v18 = vld [vmem:[%s1016_s1 + $0xa8] sm:$0xff]  ;;  %421 = vmatpush1.bf16.msra.mxu0 %v681_v6  ;;  %462 = vmatpush1.bf16.msra.mxu1 %v683_v10  ;;  %v691_v20 = vcombine.low %v45_v12, %v49_v13  ;;  %v686_v6 = vcombine.high %v38_v63, %v42_v0  ;;  %v688_v7 = vcombine.high %v39_v1, %v43_v2  ;;  %v46_v8 = vld [vmem:[%s1016_s1 + $0x50] sm:$0xff] }
   0x7   :  { %422 = vmatprep.subr.bf16.mxu0 %v690_v11  ;;  %v698_v21 = vcombine.high %v52_v14, %v56_v16  ;;  %463 = vmatprep.subr.bf16.mxu1 %v692_v15  ;;  %v700_v22 = vcombine.high %v53_v17, %v57_v18  ;;  %v60_v23 = vld [vmem:[%s1016_s1 + $0xc0] sm:$0xff]  ;;  %v61_v25 = vld [vmem:[%s1016_s1 + $0xc8] sm:$0xff]  ;;  %v697_v27 = vcombine.low %v52_v14, %v56_v16  ;;  %v50_v9 = vld [vmem:[%s1016_s1 + $0x70] sm:$0xff] }
   0x8   :  { %v64_v24 = vld [vmem:[%s1016_s1 + $0xe0] sm:$0xff]  ;;  %v65_v26 = vld [vmem:[%s1016_s1 + $0xe8] sm:$0xff]  ;;  %v699_v28 = vcombine.low %v53_v17, %v57_v18  ;;  %v47_v10 = vld [vmem:[%s1016_s1 + $0x58] sm:$0xff]  ;;  %v685_v13 = vcombine.low %v38_v63, %v42_v0  ;;  %v687_v14 = vcombine.low %v39_v1, %v43_v2  ;;  %v694_v15 = vcombine.high %v46_v8, %v50_v9 }
   0x9   :  { %v706_v29 = vcombine.high %v60_v23, %v64_v24  ;;  %v708_v30 = vcombine.high %v61_v25, %v65_v26  ;;  %v68_v31 = vld [vmem:[%s1016_s1 + $0x100] sm:$0xff]  ;;  %v69_v33 = vld [vmem:[%s1016_s1 + $0x108] sm:$0xff]  ;;  %v705_v35 = vcombine.low %v60_v23, %v64_v24  ;;  %v707_v36 = vcombine.low %v61_v25, %v65_v26  ;;  %v51_v11 = vld [vmem:[%s1016_s1 + $0x78] sm:$0xff] }
   0xa   :  { %423 = vmatpush1.bf16.msra.mxu0 %v689_v19  ;;  %464 = vmatpush1.bf16.msra.mxu1 %v691_v20  ;;  %v72_v32 = vld [vmem:[%s1016_s1 + $0x120] sm:$0xff]  ;;  %v73_v34 = vld [vmem:[%s1016_s1 + $0x128] sm:$0xff]  ;;  %v696_v16 = vcombine.high %v47_v10, %v51_v11  ;;  %v54_v17 = vld [vmem:[%s1016_s1 + $0x90] sm:$0xff]  ;;  %v613_v2 = vlaneseq }
   0xb   :  { %424 = vmatprep.subr.bf16.mxu0 %v698_v21  ;;  %465 = vmatprep.subr.bf16.mxu1 %v700_v22  ;;  %v714_v37 = vcombine.high %v68_v31, %v72_v32  ;;  %v716_v38 = vcombine.high %v69_v33, %v73_v34  ;;  %v76_v39 = vld [vmem:[%s1016_s1 + $0x140] sm:$0xff]  ;;  %v77_v41 = vld [vmem:[%s1016_s1 + $0x148] sm:$0xff]  ;;  %v713_v43 = vcombine.low %v68_v31, %v72_v32  ;;  %v58_v18 = vld [vmem:[%s1016_s1 + $0xb0] sm:$0xff] }
   0xc   :  { %v80_v40 = vld [vmem:[%s1016_s1 + $0x160] sm:$0xff]  ;;  %v81_v42 = vld [vmem:[%s1016_s1 + $0x168] sm:$0xff]  ;;  %v715_v44 = vcombine.low %v69_v33, %v73_v34  ;;  %v55_v19 = vld [vmem:[%s1016_s1 + $0x98] sm:$0xff]  ;;  %v693_v21 = vcombine.low %v46_v8, %v50_v9  ;;  %v695_v22 = vcombine.low %v47_v10, %v51_v11  ;;  %v702_v23 = vcombine.high %v54_v17, %v58_v18 }
   0xd   :  { %v722_v45 = vcombine.high %v76_v39, %v80_v40  ;;  %v724_v46 = vcombine.high %v77_v41, %v81_v42  ;;  %v84_v47 = vld [vmem:[%s1016_s1 + $0x180] sm:$0xff]  ;;  %v85_v49 = vld [vmem:[%s1016_s1 + $0x188] sm:$0xff]  ;;  %v721_v51 = vcombine.low %v76_v39, %v80_v40  ;;  %v723_v52 = vcombine.low %v77_v41, %v81_v42  ;;  %v59_v20 = vld [vmem:[%s1016_s1 + $0xb8] sm:$0xff] }
   0xe   :  { %425 = vmatpush1.bf16.msra.mxu0 %v697_v27  ;;  %466 = vmatpush1.bf16.msra.mxu1 %v699_v28  ;;  %v88_v48 = vld [vmem:[%s1016_s1 + $0x1a0] sm:$0xff]  ;;  %v89_v50 = vld [vmem:[%s1016_s1 + $0x1a8] sm:$0xff]  ;;  %v704_v24 = vcombine.high %v55_v19, %v59_v20  ;;  %v62_v25 = vld [vmem:[%s1016_s1 + $0xd0] sm:$0xff] }
   0xf   :  { %426 = vmatprep.subr.bf16.mxu0 %v706_v29  ;;  %467 = vmatprep.subr.bf16.mxu1 %v708_v30  ;;  %v730_v53 = vcombine.high %v84_v47, %v88_v48  ;;  %v732_v54 = vcombine.high %v85_v49, %v89_v50  ;;  %v92_v55 = vld [vmem:[%s1016_s1 + $0x1c0] sm:$0xff]  ;;  %v93_v57 = vld [vmem:[%s1016_s1 + $0x1c8] sm:$0xff]  ;;  %v729_v59 = vcombine.low %v84_v47, %v88_v48  ;;  %v66_v26 = vld [vmem:[%s1016_s1 + $0xf0] sm:$0xff] }
  0x10   :  { %v96_v56 = vld [vmem:[%s1016_s1 + $0x1e0] sm:$0xff]  ;;  %v97_v58 = vld [vmem:[%s1016_s1 + $0x1e8] sm:$0xff]  ;;  %v731_v60 = vcombine.low %v85_v49, %v89_v50  ;;  %v63_v27 = vld [vmem:[%s1016_s1 + $0xd8] sm:$0xff]  ;;  %v701_v29 = vcombine.low %v54_v17, %v58_v18  ;;  %v703_v30 = vcombine.low %v55_v19, %v59_v20  ;;  %v710_v31 = vcombine.high %v62_v25, %v66_v26 }
  0x11   :  { %v738_v61 = vcombine.high %v92_v55, %v96_v56  ;;  %v740_v62 = vcombine.high %v93_v57, %v97_v58  ;;  %v737_v4 = vcombine.low %v92_v55, %v96_v56  ;;  %v739_v5 = vcombine.low %v93_v57, %v97_v58  ;;  %v909_v12 = vld [vmem:[%s1017_s0] sm:$0xf]  ;;  %v67_v28 = vld [vmem:[%s1016_s1 + $0xf8] sm:$0xff]  ;;  %v70_v33 = vld [vmem:[%s1016_s1 + $0x110] sm:$0xff] }
  0x12   :  { %427 = vmatpush1.bf16.msra.mxu0 %v705_v35  ;;  %468 = vmatpush1.bf16.msra.mxu1 %v707_v36  ;;  %v712_v32 = vcombine.high %v63_v27, %v67_v28  ;;  %v74_v34 = vld [vmem:[%s1016_s1 + $0x130] sm:$0xff]  ;;  %v75_v35 = vld [vmem:[%s1016_s1 + $0x138] sm:$0xff]  ;;  %v709_v36 = vcombine.low %v62_v25, %v66_v26 }
  0x13   :  { %428 = vmatprep.subr.bf16.mxu0 %v714_v37  ;;  %469 = vmatprep.subr.bf16.mxu1 %v716_v38  ;;  %v711_v37 = vcombine.low %v63_v27, %v67_v28  ;;  %v718_v38 = vcombine.high %v70_v33, %v74_v34  ;;  %v78_v40 = vld [vmem:[%s1016_s1 + $0x150] sm:$0xff]  ;;  %v79_v42 = vld [vmem:[%s1016_s1 + $0x158] sm:$0xff] }
  0x14   :  { %v82_v41 = vld [vmem:[%s1016_s1 + $0x170] sm:$0xff]  ;;  %v87_v50 = vld [vmem:[%s1016_s1 + $0x198] sm:$0xff] }
  0x15   :  { %v86_v48 = vld [vmem:[%s1016_s1 + $0x190] sm:$0xff]  ;;  %v95_v58 = vld [vmem:[%s1016_s1 + $0x1d8] sm:$0xff] }
  0x16   :  { %429 = vmatpush1.bf16.msra.mxu0 %v713_v43  ;;  %470 = vmatpush1.bf16.msra.mxu1 %v715_v44  ;;  %v83_v43 = vld [vmem:[%s1016_s1 + $0x178] sm:$0xff]  ;;  %v717_v44 = vcombine.low %v70_v33, %v74_v34  ;;  %v90_v49 = vld [vmem:[%s1016_s1 + $0x1b0] sm:$0xff] }
  0x17   :  { %430 = vmatprep.subr.bf16.mxu0 %v722_v45  ;;  %471 = vmatprep.subr.bf16.mxu1 %v724_v46  ;;  %v726_v46 = vcombine.high %v78_v40, %v82_v41  ;;  %v728_v47 = vcombine.high %v79_v42, %v83_v43  ;;  %v94_v56 = vld [vmem:[%s1016_s1 + $0x1d0] sm:$0xff] }
  0x18   :  { %v98_v57 = vld [vmem:[%s1016_s1 + $0x1f0] sm:$0xff] }
  0x19   :  { %v741_v0 = vcombine.low %v94_v56, %v98_v57 }
  0x1a   :  { %431 = vmatpush1.bf16.msra.mxu0 %v721_v51  ;;  %472 = vmatpush1.bf16.msra.mxu1 %v723_v52  ;;  %v91_v51 = vld [vmem:[%s1016_s1 + $0x1b8] sm:$0xff]  ;;  %v725_v52 = vcombine.low %v78_v40, %v82_v41 }
  0x1b   :  { %432 = vmatprep.subr.bf16.mxu0 %v730_v53  ;;  %473 = vmatprep.subr.bf16.mxu1 %v732_v54  ;;  %v727_v53 = vcombine.low %v79_v42, %v83_v43  ;;  %v734_v54 = vcombine.high %v86_v48, %v90_v49  ;;  %v736_v55 = vcombine.high %v87_v50, %v91_v51 }
  0x1e   :  { %433 = vmatpush1.bf16.msra.mxu0 %v729_v59  ;;  %474 = vmatpush1.bf16.msra.mxu1 %v731_v60  ;;  %v99_v59 = vld [vmem:[%s1016_s1 + $0x1f8] sm:$0xff]  ;;  %v733_v60 = vcombine.low %v86_v48, %v90_v49 }
  0x1f   :  { %434 = vmatprep.subr.bf16.mxu0 %v738_v61  ;;  %475 = vmatprep.subr.bf16.mxu1 %v740_v62  ;;  %v735_v61 = vcombine.low %v87_v50, %v91_v51  ;;  %v742_v62 = vcombine.high %v94_v56, %v98_v57  ;;  %v744_v63 = vcombine.high %v95_v58, %v99_v59 }
  0x20   :  { %v743_v1 = vcombine.low %v95_v58, %v99_v59 }
  0x22   :  { %435 = vmatpush1.bf16.msra.mxu0 %v737_v4  ;;  %476 = vmatpush1.bf16.msra.mxu1 %v739_v5  ;;  %v614_v4 = vshrl.u32 %v613_v2, 7 }
  0x23   :  { %502 = vmatprep.subr.bf16.mxu0 %v686_v6  ;;  %543 = vmatprep.subr.bf16.mxu1 %v688_v7  ;;  %v611_v6 = vld [vmem:[%s1018_s2] sm:$0xff] }
  0x24   :  { %v615_v5 = vsub.s32 0, %v614_v4  ;;  %v623_v7 = vsub.s32 2, %v614_v4  ;;  %v619_v8 = vsub.s32 1, %v614_v4  ;;  %v627_v9 = vsub.s32 3, %v614_v4 }
  0x25   :  { %453 = vmatmul.mubr.bf16.vlgmr.msra.gmra.mrb[0].mxu0 %v909_v12  ;;  %494 = vmatmul.mubr.bf16.vlgmr.msra.gmra.mrb[0].mxu1 %v909_v12  ;;  %v643_v33 = vsub.s32 7, %v614_v4 }
  0x26   :  { %503 = vmatpush1.bf16.msra.mxu0 %v685_v13  ;;  %544 = vmatpush1.bf16.msra.mxu1 %v687_v14  ;;  %v616_v10 = vrot.slane %v611_v6, %v615_v5  ;;  %v624_v13 = vrot.slane %v611_v6, %v623_v7  ;;  %v620_v14 = vrot.slane %v611_v6, %v619_v8 }
  0x27   :  { %504 = vmatprep.subr.bf16.mxu0 %v694_v15  ;;  %545 = vmatprep.subr.bf16.mxu1 %v696_v16  ;;  %v628_v17 = vrot.slane %v611_v6, %v627_v9 }
  0x28   :  { %534 = vmatprep.mubr.bf16.mxu0 %v763_v3  ;;  %575 = vmatprep.mubr.bf16.mxu1 %v763_v3  ;;  %v71_v3 = vld [vmem:[%s1016_s1 + $0x118] sm:$0xff] }
  0x29   :  { %v720_v39 = vcombine.high %v71_v3, %v75_v35  ;;  %v719_v45 = vcombine.low %v71_v3, %v75_v35 }
  0x2a   :  { %505 = vmatpush1.bf16.msra.mxu0 %v693_v21  ;;  %546 = vmatpush1.bf16.msra.mxu1 %v695_v22 }
  0x2b   :  { %506 = vmatprep.subr.bf16.mxu0 %v702_v23  ;;  %547 = vmatprep.subr.bf16.mxu1 %v704_v24 }
  0x2e   :  { %507 = vmatpush1.bf16.msra.mxu0 %v701_v29  ;;  %548 = vmatpush1.bf16.msra.mxu1 %v703_v30  ;;  %v631_v30 = vsub.s32 4, %v614_v4 }
  0x2f   :  { %508 = vmatprep.subr.bf16.mxu0 %v710_v31  ;;  %549 = vmatprep.subr.bf16.mxu1 %v712_v32  ;;  %v639_v31 = vsub.s32 6, %v614_v4  ;;  %v635_v32 = vsub.s32 5, %v614_v4 }
  0x30   :  { %v632_v34 = vrot.slane %v611_v6, %v631_v30 }
  0x31   :  { %v640_v35 = vrot.slane %v611_v6, %v639_v31 }
  0x32   :  { %509 = vmatpush1.bf16.msra.mxu0 %v709_v36  ;;  %550 = vmatpush1.bf16.msra.mxu1 %v711_v37  ;;  %v636_v36 = vrot.slane %v611_v6, %v635_v32 }
  0x33   :  { %510 = vmatprep.subr.bf16.mxu0 %v718_v38  ;;  %551 = vmatprep.subr.bf16.mxu1 %v720_v39  ;;  %v644_v39 = vrot.slane %v611_v6, %v643_v33 }
  0x36   :  { %511 = vmatpush1.bf16.msra.mxu0 %v717_v44  ;;  %552 = vmatpush1.bf16.msra.mxu1 %v719_v45 }
  0x37   :  { %512 = vmatprep.subr.bf16.mxu0 %v726_v46  ;;  %553 = vmatprep.subr.bf16.mxu1 %v728_v47 }
  0x3a   :  { %513 = vmatpush1.bf16.msra.mxu0 %v725_v52  ;;  %554 = vmatpush1.bf16.msra.mxu1 %v727_v53 }
  0x3b   :  { %514 = vmatprep.subr.bf16.mxu0 %v734_v54  ;;  %555 = vmatprep.subr.bf16.mxu1 %v736_v55 }
  0x3e   :  { %515 = vmatpush1.bf16.msra.mxu0 %v733_v60  ;;  %556 = vmatpush1.bf16.msra.mxu1 %v735_v61 }
  0x3f   :  { %516 = vmatprep.subr.bf16.mxu0 %v742_v62  ;;  %557 = vmatprep.subr.bf16.mxu1 %v744_v63 }
  0x42   :  { %517 = vmatpush1.bf16.msra.mxu0 %v741_v0  ;;  %558 = vmatpush1.bf16.msra.mxu1 %v743_v1 }
  0x45   :  { %535 = vmatmul.mubr.bf16.vlgmr.msra.gmra.mrb[4].mxu0 %v909_v12  ;;  %576 = vmatmul.mubr.bf16.vlgmr.msra.gmra.mrb[4].mxu1 %v909_v12 }
  0xf8   :  { %v454_v11 = vpop.f32.mrb[0].mxu0  ;;  %v495_v15 = vpop.f32.mrb[0].mxu1 }
  0xf9   :  { %v456_v16 = vpop.f32.mrb[1].mxu0  ;;  %v497_v18 = vpop.f32.mrb[1].mxu1  ;;  %v653_v12 = vadd.f32 %v616_v10, %v454_v11  ;;  %v655_v22 = vadd.f32 %v624_v13, %v495_v15 }
  0xfa   :  { %v458_v19 = vpop.f32.mrb[2].mxu0  ;;  %v499_v20 = vpop.f32.mrb[2].mxu1  ;;  %v654_v23 = vadd.f32 %v620_v14, %v456_v16  ;;  %v656_v25 = vadd.f32 %v628_v17, %v497_v18 }
  0xfb   :  { %v459_v21 = vpop.f32.mrb[3].mxu0  ;;  %v500_v24 = vpop.f32.mrb[3].mxu1  ;;  %747 = vtanh.f32 %v653_v12 }
  0xfc   :  { %749 = vtanh.f32 %v655_v22 }
  0xfd   :  { %751 = vtanh.f32 %v654_v23 }
  0xfe   :  { %753 = vtanh.f32 %v656_v25 }
 0x105   :  { %v748_v26 = vpop.eup %747 }
 0x106   :  { %v750_v27 = vpop.eup %749  ;;  %669 = vst [vmem:[%s1019_s3] sm:$0xff] %v748_v26 }
 0x107   :  { %v752_v28 = vpop.eup %751  ;;  %671 = vst [vmem:[%s1019_s3 + $0x10] sm:$0xff] %v750_v27 }
 0x108   :  { %v754_v29 = vpop.eup %753  ;;  %670 = vst [vmem:[%s1019_s3 + $0x8] sm:$0xff] %v752_v28 }
 0x109   :  { %672 = vst [vmem:[%s1019_s3 + $0x18] sm:$0xff] %v754_v29 }
 0x118   :  { %v536_v3 = vpop.f32.mrb[4].mxu0  ;;  %v577_v37 = vpop.f32.mrb[4].mxu1 }
 0x119   :  { %v538_v38 = vpop.f32.mrb[5].mxu0  ;;  %v579_v40 = vpop.f32.mrb[5].mxu1  ;;  %v657_v42 = vadd.f32 %v632_v34, %v536_v3  ;;  %v659_v45 = vadd.f32 %v640_v35, %v577_v37 }
 0x11a   :  { %v540_v41 = vpop.f32.mrb[6].mxu0  ;;  %v581_v43 = vpop.f32.mrb[6].mxu1  ;;  %v658_v46 = vadd.f32 %v636_v36, %v538_v38  ;;  %v660_v48 = vadd.f32 %v644_v39, %v579_v40 }
 0x11b   :  { %v541_v44 = vpop.f32.mrb[7].mxu0  ;;  %v582_v47 = vpop.f32.mrb[7].mxu1  ;;  %755 = vtanh.f32 %v657_v42 }
 0x11c   :  { %757 = vtanh.f32 %v659_v45 }
 0x11d   :  { %759 = vtanh.f32 %v658_v46 }
 0x11e   :  { %761 = vtanh.f32 %v660_v48 }
 0x125   :  { %v756_v49 = vpop.eup %755 }
 0x126   :  { %v758_v50 = vpop.eup %757  ;;  %673 = vst [vmem:[%s1019_s3 + $0x20] sm:$0xff] %v756_v49 }
 0x127   :  { %v760_v51 = vpop.eup %759  ;;  %675 = vst [vmem:[%s1019_s3 + $0x30] sm:$0xff] %v758_v50 }
 0x128   :  { %v762_v52 = vpop.eup %761  ;;  %674 = vst [vmem:[%s1019_s3 + $0x28] sm:$0xff] %v760_v51 }
 0x129   :  { %676 = vst [vmem:[%s1019_s3 + $0x38] sm:$0xff] %v762_v52 }

</bundles_post_ra>
